<compile_context>
chip_gen: v6e
topology: v6e:2x2x1
jax: 0.10.0
libtpu: 0.0.40
codegen_flags: <defaults>
</compile_context>

<pallas_src>
import math

import jax
import jax.numpy as jnp
from jax.experimental import pallas as pl
from jax.experimental.pallas import tpu as pltpu

_LANE = 128
_TM_MAX = 4096          # rows per tile (f32: 4 MiB x-tile per buffer at D=256)
_MIN_PALLAS_ROWS = 512  # below this, plain XLA matmul wins (launch overhead)


def _round_up(x, m):
    return ((x + m - 1) // m) * m


def _sublane(dtype):
    # packed-row granularity: 8 for 4-byte, 16 for 2-byte, 32 for 1-byte
    return max(8, 32 // jnp.dtype(dtype).itemsize)


def _linear_kernel(x_ref, w_ref, b_ref, o_ref):
    # MXU matmul with f32 accumulation + broadcast bias add, all in VMEM.
    acc = jnp.dot(x_ref[...], w_ref[...], preferred_element_type=jnp.float32)
    o_ref[...] = (acc + b_ref[...]).astype(o_ref.dtype)


def feat_classifier_forward(x, w_t, b, *, compute_dtype=None,
                            min_pallas_rows=_MIN_PALLAS_ROWS):
    """Linear classifier head: x @ w_t + b.

    x:   (N, D) activations
    w_t: (D, C) transposed PyTorch Linear weight
    b:   (C,) or (1, C) bias (kept in f32; accumulation is f32)
    compute_dtype: optional streaming dtype (e.g. jnp.bfloat16) applied ONLY
        to the resident weight; pass x already in bf16 yourself if you want
        bf16 activation streaming (a wrapper cast would cost an extra HBM
        pass and erase the win).
    """
    N, D = x.shape
    D2, C = w_t.shape
    assert D == D2, (D, D2)
    b = b.reshape(1, C).astype(jnp.float32)
    out_dtype = x.dtype

    if compute_dtype is not None:
        w_t = w_t.astype(compute_dtype)   # resident, one-time downcast

    # --- small-N fallback: custom-call launch costs more than the matmul ----
    if N < min_pallas_rows:
        acc = jnp.dot(x, w_t, preferred_element_type=jnp.float32) + b
        return acc.astype(out_dtype)

    # --- row tiling ----------------------------------------------------------
    sub = _sublane(x.dtype)
    n_pad = _round_up(N, sub)            # tiny pad (<= sub-1 rows), often a no-op
    if n_pad != N:
        x = jnp.pad(x, ((0, n_pad - N), (0, 0)))

    # Big tile to amortize per-step overhead, but keep >= 2 grid steps so the
    # "parallel" axis splits across both TensorCores on v7x.
    tm = min(_TM_MAX, _round_up(pl.cdiv(n_pad, 2), sub))
    tm = max(tm, sub)
    grid = (pl.cdiv(n_pad, tm),)         # trailing block clipped by Pallas

    x_isz = jnp.dtype(x.dtype).itemsize
    w_isz = jnp.dtype(w_t.dtype).itemsize
    o_isz = jnp.dtype(out_dtype).itemsize
    cost = pl.CostEstimate(
        flops=2 * n_pad * D * C,
        transcendentals=0,
        bytes_accessed=(n_pad * D * x_isz      # stream x
                        + D * C * w_isz        # weight (resident)
                        + C * 4                # bias
                        + n_pad * C * o_isz),  # output
    )

    out = pl.pallas_call(
        _linear_kernel,
        out_shape=jax.ShapeDtypeStruct((n_pad, C), out_dtype),
        grid_spec=pl.GridSpec(
            grid=grid,
            in_specs=[
                # x: one (tm, D) row tile per step -> auto double-buffered
                pl.BlockSpec((tm, D), lambda i: (i, 0)),
                # W and b: constant block index -> resident in VMEM
                pl.BlockSpec((D, C), lambda i: (0, 0)),
                pl.BlockSpec((1, C), lambda i: (0, 0)),
            ],
            out_specs=pl.BlockSpec((tm, C), lambda i: (i, 0)),
        ),
        compiler_params=pltpu.CompilerParams(
            # rows are independent -> shard across TensorCores on v7x
            dimension_semantics=("parallel",),
        ),
        cost_estimate=cost,
    )(x, w_t, b)

    return out[:N] if n_pad != N else out


def init_params(key, bottleneck_dim, class_num):
    # Mirrors init_weights for Linear: xavier_normal_(weight), zeros_(bias)
    std = math.sqrt(2.0 / (bottleneck_dim + class_num))
    w = std * jax.random.normal(key, (class_num, bottleneck_dim), dtype=jnp.float32)
    b = jnp.zeros((1, class_num), dtype=jnp.float32)
    # store transposed for the kernel: (D, C)
    return w.T, b
    # TODO(synk): type='wn' (weight_norm reparameterization) not implemented;
    # only the default 'linear' path is reproduced.


if __name__ == "__main__":
    key = jax.random.PRNGKey(0)
    k_x, k_w, k_x2 = jax.random.split(key, 3)

    bottleneck_dim = 256
    class_num = 16

    w_t, b = init_params(k_w, bottleneck_dim, class_num)

    # small batch consistent with the module's default usage -> XLA fallback path
    batch = 8
    x = jax.random.normal(k_x, (batch, bottleneck_dim), dtype=jnp.float32)
    out = jax.block_until_ready(feat_classifier_forward(x, w_t, b))
    ref = x @ w_t + b
    assert out.shape == (batch, class_num)
    assert jnp.allclose(out, ref, atol=1e-4, rtol=1e-4)

    # ragged batch above the fallback threshold -> Pallas path
    # (1030 -> sublane pad to 1032, tm=520, grid=(2,), trailing block clipped)
    batch2 = 1030
    x2 = jax.random.normal(k_x2, (batch2, bottleneck_dim), dtype=jnp.float32)
    out2 = jax.block_until_ready(feat_classifier_forward(x2, w_t, b))
    ref2 = x2 @ w_t + b
    assert out2.shape == (batch2, class_num)
    assert jnp.allclose(out2, ref2, atol=1e-4, rtol=1e-4)

    # bf16-weight streaming path (looser tolerance), still f32 accumulation
    out3 = jax.block_until_ready(
        feat_classifier_forward(x2, w_t, b, compute_dtype=jnp.bfloat16))
    assert out3.shape == (batch2, class_num)
    assert jnp.allclose(out3, ref2, atol=5e-2, rtol=5e-2)

    print("KERNEL_OK")
</pallas_src>

<mosaic_0001>
module attributes {stable_mosaic.version = 11 : i64} {
  func.func @_linear_kernel(%arg0: i32, %arg1: memref<520x256xf32, #tpu.memory_space<vmem>>, %arg2: memref<256x16xf32, #tpu.memory_space<vmem>>, %arg3: memref<1x16xf32, #tpu.memory_space<vmem>>, %arg4: memref<520x16xf32, #tpu.memory_space<vmem>>) attributes {dimension_semantics = [#tpu.dimension_semantics<parallel>], iteration_bounds = array<i64: 2>, scalar_prefetch = 0 : i64, scratch_operands = 0 : i64, tpu.core_type = #tpu.core_type<tc>, window_params = [{transform_indices = @transform_0, window_bounds = array<i64: 520, 256>}, {pipeline_mode = #tpu.pipeline_mode<synchronous>, transform_indices = @transform_1, window_bounds = array<i64: 256, 16>}, {pipeline_mode = #tpu.pipeline_mode<synchronous>, transform_indices = @transform_2, window_bounds = array<i64: 1, 16>}, {transform_indices = @transform_3, window_bounds = array<i64: 520, 16>}]} {
    %c0 = arith.constant 0 : index
    %c0_0 = arith.constant 0 : index
    %0 = vector.load %arg1[%c0, %c0_0] : memref<520x256xf32, #tpu.memory_space<vmem>>, vector<520x256xf32>
    %c0_1 = arith.constant 0 : index
    %c0_2 = arith.constant 0 : index
    %1 = vector.load %arg2[%c0_1, %c0_2] : memref<256x16xf32, #tpu.memory_space<vmem>>, vector<256x16xf32>
    %cst = arith.constant dense<0.000000e+00> : vector<520x16xf32>
    %2 = tpu.matmul %0, %1, %cst {dimension_numbers = #tpu.dot_dimension_numbers<[1], [0], [0], [1], [0, 0, 1, 1], [], []>} : vector<520x256xf32>, vector<256x16xf32>, vector<520x16xf32> -> vector<520x16xf32>
    %c0_3 = arith.constant 0 : index
    %c0_4 = arith.constant 0 : index
    %3 = vector.load %arg3[%c0_3, %c0_4] : memref<1x16xf32, #tpu.memory_space<vmem>>, vector<1x16xf32>
    %4 = vector.broadcast %3 : vector<1x16xf32> to vector<520x16xf32>
    %5 = arith.addf %2, %4 : vector<520x16xf32>
    %c0_5 = arith.constant 0 : index
    %c0_6 = arith.constant 0 : index
    %6 = vector.load %arg4[%c0_5, %c0_6] : memref<520x16xf32, #tpu.memory_space<vmem>>, vector<520x16xf32>
    tpu.vector_store %arg4[%c0_5, %c0_6], %5 {strides = array<i32>} : memref<520x16xf32, #tpu.memory_space<vmem>>, vector<520x16xf32>,
    return
  }
  func.func @transform_0(%arg0: i32) -> (i32, i32) {
    %c0_i32 = arith.constant 0 : i32
    %c0_i32_0 = arith.constant 0 : i32
    return %arg0, %c0_i32 : i32, i32
  }
  func.func @transform_1(%arg0: i32) -> (i32, i32) {
    %c0_i32 = arith.constant 0 : i32
    %c0_i32_0 = arith.constant 0 : i32
    %c0_i32_1 = arith.constant 0 : i32
    return %c0_i32, %c0_i32_0 : i32, i32
  }
  func.func @transform_2(%arg0: i32) -> (i32, i32) {
    %c0_i32 = arith.constant 0 : i32
    %c0_i32_0 = arith.constant 0 : i32
    %c0_i32_1 = arith.constant 0 : i32
    return %c0_i32, %c0_i32_0 : i32, i32
  }
  func.func @transform_3(%arg0: i32) -> (i32, i32) {
    %c0_i32 = arith.constant 0 : i32
    %c0_i32_0 = arith.constant 0 : i32
    return %arg0, %c0_i32 : i32, i32
  }
}

</mosaic_0001>

<bundles_post_ra>
// kernel: tpu_custom_call.1
= control target key start
LH: loop header
LB: loop body
LE: loop exit
PB: predicated region body
PF: predicated region fallthrough
CT: control target
= control target key end

     0   :  { %8 = vsyncpa [#allocation3], 0  ;;  %s2549_s0 = inlined_call_operand.hbm [shape: f32[1032,256], index: 0, kind: input, shape index: {}]   ;;  %s2550_s1 = inlined_call_operand.vmem [shape: f32[256,16], index: 1, kind: input, shape index: {}]   ;;  %s2551_s2 = inlined_call_operand.hbm [shape: f32[1,16], index: 2, kind: input, shape index: {}]   ;;  %s2552_s3 = inlined_call_operand.vmem [shape: f32[1032,16], index: 3, kind: output, shape index: {}]  }
   0x1   :  { %10 = vsyncpa [#allocation3 + $0x1], 0 }
   0x2   :  { %11 = vsyncpa [#allocation5], 0  ;;  %s1726_s12 = smov 0   ;;  %s1728_s13 = smov 0  }
   0x3   :  { %s1730_s14 = smov 0   ;;  %s1732_s15 = smov 0  }
   0x4 LB: > { %s1745_s16 = sadd.s32 4294967295, %s1667_s15   ;;  %s1748_s17 = sadd.s32 1, %s1667_s15   ;;  %s1667_s15 = sphi %s1732_s15, %s2568_s15   ;;  %s1663_s14 = sphi %s1730_s14, %s2567_s14   ;;  %s1659_s13 = sphi %s1728_s13, %s2566_s13   ;;  %s1655_s12 = sphi %s1726_s12, %s2565_s12  }
   0x5   : > { %s21_s18 = ssub.s32 %s1667_s15, %s1748_s17  ;;  %s24_s19 = sadd.s32 1, %s1663_s14 }
   0x6   : > { %p22_p0 = scmp.eq.s32.totalorder %s21_s18, 0  ;;  %p31_p1 = scmp.ne.s32.totalorder %s1663_s14, %s1659_s13 }
   0x7   : > { %p32_p2 = scmp.eq.s32.totalorder %s1667_s15, 0  ;;  %p37_p3 = scmp.ne.s32.totalorder %s1659_s13, %s1655_s12 }
   0x8   : > { %s1758_s20 = scalar_select %p22_p0, %s1663_s14, %s24_s19  }
   0x9   : > { %p1760_p4 = por %p32_p2, %p31_p1  ;;  %p38_p5 = scmp.eq.s32.totalorder %s1745_s16, 0 }
   0xa   : > { %p103_p6 = scmp.eq.s32.totalorder %s1745_s16, 1  ;;  %p1332_p7 = scmp.ge.s32.totalorder %s1667_s15, 1 }
   0xb   : > { %p1769_p8 = por %p38_p5, %p37_p3  ;;  %p116_p9 = scmp.lt.s32.totalorder %s1667_s15, 3 }
   0xc   : > { %p1774_p10 = por %p103_p6, %p31_p1  ;;  %s1701_s25 = smov [#allocation4]  }
   0xd   : > { %s2555_s22 = scalar_select %p1769_p8, 1, 0 }
   0xe   : > { %s2556_s23 = scalar_select %p1774_p10, 1, 0 }
   0xf   : > { %p1778_p11 = pnand %p1332_p7, %p116_p9  ;;  %s132_s26 = sshll.u32 %s1701_s25, 4  ;;  %s133_s26 = int_to_ptr.vmem [resolvable:$true] %s132_s26 }
  0x10   : > { %s1556_s27 = scalar_lea.vmem %s133_s26, 16  ;;  %s1563_s28 = scalar_lea.vmem %s133_s26, 32 }
  0x11   : > { %p1439_p12 = pneg %p1778_p11  ;;  %p1557_p2 = scmp.ne.s32.totalorder %s133_s26, %s1556_s27 }
  0x12   : > { %p1564_p6 = scmp.lt.s32.totalorder %s133_s26, %s133_s26  ;;  %p1565_p10 = scmp.lt.s32.totalorder %s1563_s28, %s1556_s27 }
  0x13   : > { %p1440_p13 = pnand %p1439_p12, %p38_p5 }
  0x14   : > { %p1566_p7 = por %p1565_p10, %p1564_p6 }
  0x15   : > { %p1547_p0 = pneg %p1440_p13 }
  0x17   : > { %p1559_p3 = pnand %p1557_p2, %p1547_p0 }
  0x19   : > { %p1560_p1 = pneg %p1559_p3 }
  0x1b   : > { %p1567_p9 = pnand %p1566_p7, %p1560_p1 }
  0x1d   : > { %1570 = shalt.err (!%p1567_p9)
}
  0x1e   : > { %1442 = dma.hbm_to_vmem [thread:$0]  (!%p1440_p13), %s2551_s2, 16, %s133_s26, [#allocation5]  }
  0x1f   : > { %p1334_p8 = scmp.ge.s32.totalorder %s1667_s15, 2 }
  0x21   : > { %139 = sbr.rel (%p1334_p8) target bundleno = 72 (0x48), region = 24 }
  0x26   : > { %142 = sbr.rel (!%p1760_p4) target bundleno = 72 (0x48), region = 28  ;;  %s143_s4 = sand.u32 (%p1760_p4), 1, %s1663_s14  }
  0x27   : > { %s148_s5 = smul.u32 (%p1760_p4), 65, %s1667_s15  ;;  %s1797_s10 = scalar_lea.sflag (%p1760_p4), [#allocation3], %s143_s4 }
  0x28   : > { %s1431_s6 = smul.u32 (%p1760_p4), 1040, %s143_s4 }
  0x29   : > { %s149_s7 = ssub.s32 (%p1760_p4), 129, %s148_s5 }
  0x2a   : > { %p150_p12 = scmp.lt.s32.totalorder (%p1760_p4), %s149_s7, 65  ;;  %s147_s11 = scalar_lea.vmem (%p1760_p4), [#allocation2], %s1431_s6 }
  0x2c   : > { %s2570_s7 = smov (!%p150_p12, %s149_s7), 65 }
  0x2d   : > { %s1794_s8 = sshll.u32 %s2570_s7, 8 }
  0x2e   : > { %s155_s9 = ssub.s32 16640, %s1794_s8 }
  0x2f   : > { %156 = vsyncadd %s1797_s10, %s155_s9  ;;  %p1337_p4 = scmp.ne.s32.totalorder %s1794_s8, 0  ;;  %s1366_s12 = smul.u32 16640, %s1667_s15 }
  0x30   : > { %s162_s18 = sshll.u32 %s147_s11, 4  ;;  %s1575_s15 = scalar_lea.hbm %s2549_s0, 33024  ;;  %s1807_s18 = int_to_ptr.vmem [resolvable:$true] %s162_s18 }
  0x31   : > { %s1805_s25 = scalar_lea.hbm %s2549_s0, %s1366_s12 }
  0x32   : > { %s1571_s26 = scalar_lea.hbm %s1805_s25, %s1794_s8  ;;  %p1576_p0 = scmp.lt.s32.totalorder %s1805_s25, %s2549_s0 }
  0x33   : > { %p1572_p8 = scmp.ne.s32.totalorder %s1805_s25, %s1571_s26  ;;  %p1577_p2 = scmp.lt.s32.totalorder %s1575_s15, %s1571_s26 }
  0x35   : > { %p1573_p10 = pnand %p1572_p8, %p1337_p4  ;;  %p1578_p3 = por %p1577_p2, %p1576_p0 }
  0x37   : > { %p1574_p13 = pneg %p1573_p10 }
  0x39   : > { %p1579_p1 = pnand %p1578_p3, %p1574_p13 }
  0x3b   : > { %1582 = shalt.err (!%p1579_p1)
}
  0x3c   : > { %s1583_s4 = scalar_lea.vmem %s1807_s18, %s1794_s8  ;;  %s1702_s5 = smov [#allocation2]  }
  0x3d   : > { %p1584_p6 = scmp.ne.s32.totalorder %s1807_s18, %s1583_s4  ;;  %s1587_s6 = sshll.u32 %s1702_s5, 4  ;;  %s1588_s6 = int_to_ptr.vmem [resolvable:$false] %s1587_s6 }
  0x3e   : > { %s1589_s7 = scalar_lea.vmem %s1588_s6, 33280  ;;  %p1590_p12 = scmp.lt.s32.totalorder %s1807_s18, %s1588_s6 }
  0x3f   : > { %p1585_p7 = pnand %p1584_p6, %p1337_p4  ;;  %p1591_p8 = scmp.lt.s32.totalorder %s1589_s7, %s1583_s4 }
  0x41   : > { %p1586_p9 = pneg %p1585_p7  ;;  %p1592_p10 = por %p1591_p8, %p1590_p12 }
  0x43   : > { %p1593_p0 = pnand %p1592_p10, %p1586_p9 }
  0x45   : > { %1596 = shalt.err (!%p1593_p0)
}
  0x46   : > { %s1703_s9 = smov 256   ;;  %s1704_s11 = smov 16  }
  0x47   : > { %168 = dma.hbm_to_vmem [thread:$0]  (%p1337_p4), %s1805_s25, %s1794_s8, %s1807_s18, %s1797_s10, %s1703_s9, %s1703_s9, %s1704_s11  }
  0x48 PF: > { %174 = sbr.rel (%p1778_p11) target bundleno = 533 (0x215), region = 32  ;;  %s1836_s12 = sand.u32 (!%p1778_p11), 1, %s1659_s13  }
  0x49   : > { %s1432_s19 = smul.u32 (!%p1778_p11), 1040, %s1836_s12  ;;  %s177_s21 = scalar_lea.sflag (!%p1778_p11), [#allocation3], %s1836_s12 }
  0x4a   : > { %p2558_p13 = scmp.ne.s32.totalorder (!%p1778_p11), %s2555_s22, 0 }
  0x4b   : > { %s1840_s26 = scalar_lea.vmem (!%p1778_p11), [#allocation2], %s1432_s19 }
  0x4d   : > { %1646 = dma.done.wait (%p2558_p13), %s177_s21, 16640  }
  0x4e   : > { %1648 = vsyncadd (%p2558_p13), %s177_s21, 4294950656 }
  0x4f   : > { %1650 = dma.done.wait (%p38_p5), [#allocation5], 16  }
  0x50   : > { %1652 = vsyncadd (%p38_p5), [#allocation5], 4294967280  ;;  %v1705_v0 = vmov 0.0   ;;  %v362_v1 = vld [vmem:[%s2550_s1 + $0x78] sm:$0xff]  ;;  %v361_v2 = vld [vmem:[%s2550_s1 + $0x70] sm:$0xff]  ;;  %s1433_s28 = smul.u32 520, %s1836_s12 }
  0x51   : > { %386 = vmatprep.subr.mxu0 %v1705_v0  ;;  %1367 = vmatprep.subr.mxu1 %v1705_v0  ;;  %v360_v3 = vld [vmem:[%s2550_s1 + $0x68] sm:$0xff]  ;;  %v359_v4 = vld [vmem:[%s2550_s1 + $0x60] sm:$0xff]  ;;  %v358_v5 = vld [vmem:[%s2550_s1 + $0x58] sm:$0xff]  ;;  %vm776_vm0 = vcmask 130048   ;;  %p2559_p5 = scmp.ne.s32.totalorder %s2556_s23, 0 }
  0x52   : > { %387 = vmatpush1.msra.mxu0 %v362_v1  ;;  %1399 = vmatpush1.msra.mxu1 %v362_v1  ;;  %v357_v6 = vld [vmem:[%s2550_s1 + $0x50] sm:$0xff]  ;;  %v356_v7 = vld [vmem:[%s2550_s1 + $0x48] sm:$0xff]  ;;  %v355_v8 = vld [vmem:[%s2550_s1 + $0x40] sm:$0xff]  ;;  %s2144_s15 = scalar_lea.vmem [#allocation6], %s1433_s28   ;;  %s849_s12 = smul.u32 (%p2559_p5), 65, %s1745_s16 }
  0x53   : > { %388 = vmatprep.subr.mxu0 %v1705_v0  ;;  %1368 = vmatprep.subr.mxu1 %v1705_v0  ;;  %v354_v9 = vld [vmem:[%s2550_s1 + $0x38] sm:$0xff]  ;;  %v353_v10 = vld [vmem:[%s2550_s1 + $0x30] sm:$0xff]  ;;  %v352_v11 = vld [vmem:[%s2550_s1 + $0x28] sm:$0xff] }
  0x54   : > { %389 = vmatpush1.msra.mxu0 %v361_v2  ;;  %1400 = vmatpush1.msra.mxu1 %v361_v2  ;;  %v351_v12 = vld [vmem:[%s2550_s1 + $0x20] sm:$0xff]  ;;  %v350_v13 = vld [vmem:[%s2550_s1 + $0x18] sm:$0xff]  ;;  %v349_v14 = vld [vmem:[%s2550_s1 + $0x10] sm:$0xff]  ;;  %s850_s29 = ssub.s32 (%p2559_p5), 129, %s849_s12 }
  0x55   : > { %390 = vmatprep.subr.mxu0 %v1705_v0  ;;  %1369 = vmatprep.subr.mxu1 %v1705_v0  ;;  %v348_v15 = vld [vmem:[%s2550_s1 + $0x8] sm:$0xff]  ;;  %v347_v16 = vld [vmem:[%s2550_s1] sm:$0xff]  ;;  %v378_v17 = vld [vmem:[%s2550_s1 + $0xf8] sm:$0xff]  ;;  %p851_p11 = scmp.lt.s32.totalorder (%p2559_p5), %s850_s29, 65 }
  0x56   : > { %391 = vmatpush1.msra.mxu0 %v360_v3  ;;  %1401 = vmatpush1.msra.mxu1 %v360_v3  ;;  %v377_v18 = vld [vmem:[%s2550_s1 + $0xf0] sm:$0xff]  ;;  %v376_v19 = vld [vmem:[%s2550_s1 + $0xe8] sm:$0xff]  ;;  %v375_v20 = vld [vmem:[%s2550_s1 + $0xe0] sm:$0xff] }
  0x57   : > { %392 = vmatprep.subr.mxu0 %v1705_v0  ;;  %1370 = vmatprep.subr.mxu1 %v1705_v0  ;;  %v374_v21 = vld [vmem:[%s2550_s1 + $0xd8] sm:$0xff]  ;;  %v373_v22 = vld [vmem:[%s2550_s1 + $0xd0] sm:$0xff]  ;;  %v372_v23 = vld [vmem:[%s2550_s1 + $0xc8] sm:$0xff] }
  0x58   : > { %393 = vmatpush1.msra.mxu0 %v359_v4  ;;  %1402 = vmatpush1.msra.mxu1 %v359_v4  ;;  %v371_v24 = vld [vmem:[%s2550_s1 + $0xc0] sm:$0xff]  ;;  %v370_v25 = vld [vmem:[%s2550_s1 + $0xb8] sm:$0xff]  ;;  %v369_v26 = vld [vmem:[%s2550_s1 + $0xb0] sm:$0xff] }
  0x59   : > { %394 = vmatprep.subr.mxu0 %v1705_v0  ;;  %1371 = vmatprep.subr.mxu1 %v1705_v0  ;;  %v368_v27 = vld [vmem:[%s2550_s1 + $0xa8] sm:$0xff]  ;;  %v367_v28 = vld [vmem:[%s2550_s1 + $0xa0] sm:$0xff]  ;;  %v366_v29 = vld [vmem:[%s2550_s1 + $0x98] sm:$0xff] }
  0x5a   : > { %395 = vmatpush1.msra.mxu0 %v358_v5  ;;  %1403 = vmatpush1.msra.mxu1 %v358_v5  ;;  %v365_v30 = vld [vmem:[%s2550_s1 + $0x90] sm:$0xff]  ;;  %v364_v31 = vld [vmem:[%s2550_s1 + $0x88] sm:$0xff]  ;;  %v363_v33 = vld [vmem:[%s2550_s1 + $0x80] sm:$0xff] }
  0x5b   : > { %396 = vmatprep.subr.mxu0 %v1705_v0  ;;  %1372 = vmatprep.subr.mxu1 %v1705_v0  ;;  %v218_v32 = vld [vmem:[%s1840_s26 + $0x8] sm:$0xff]  ;;  %v217_v34 = vld [vmem:[%s1840_s26] sm:$0xff]  ;;  %v284_v35 = vld [vmem:[%s1840_s26 + $0x218] sm:$0xff] }
  0x5c   : > { %397 = vmatpush1.msra.mxu0 %v357_v6  ;;  %1404 = vmatpush1.msra.mxu1 %v357_v6  ;;  %v220_v36 = vld [vmem:[%s1840_s26 + $0x18] sm:$0xff]  ;;  %v283_v37 = vld [vmem:[%s1840_s26 + $0x210] sm:$0xff]  ;;  %v286_v38 = vld [vmem:[%s1840_s26 + $0x228] sm:$0xff] }
  0x5d   : > { %398 = vmatprep.subr.mxu0 %v1705_v0  ;;  %1373 = vmatprep.subr.mxu1 %v1705_v0  ;;  %v219_v39 = vld [vmem:[%s1840_s26 + $0x10] sm:$0xff]  ;;  %v222_v40 = vld [vmem:[%s1840_s26 + $0x28] sm:$0xff]  ;;  %v285_v41 = vld [vmem:[%s1840_s26 + $0x220] sm:$0xff] }
  0x5e   : > { %399 = vmatpush1.msra.mxu0 %v356_v7  ;;  %1405 = vmatpush1.msra.mxu1 %v356_v7  ;;  %v288_v42 = vld [vmem:[%s1840_s26 + $0x238] sm:$0xff]  ;;  %v221_v43 = vld [vmem:[%s1840_s26 + $0x20] sm:$0xff]  ;;  %v287_v45 = vld [vmem:[%s1840_s26 + $0x230] sm:$0xff] }
  0x5f   : > { %400 = vmatprep.subr.mxu0 %v1705_v0  ;;  %1374 = vmatprep.subr.mxu1 %v1705_v0  ;;  %v224_v44 = vld [vmem:[%s1840_s26 + $0x38] sm:$0xff]  ;;  %v290_v46 = vld [vmem:[%s1840_s26 + $0x248] sm:$0xff]  ;;  %v223_v47 = vld [vmem:[%s1840_s26 + $0x30] sm:$0xff] }
  0x60   : > { %401 = vmatpush1.msra.mxu0 %v355_v8  ;;  %1406 = vmatpush1.msra.mxu1 %v355_v8  ;;  %v226_v48 = vld [vmem:[%s1840_s26 + $0x48] sm:$0xff]  ;;  %v289_v49 = vld [vmem:[%s1840_s26 + $0x240] sm:$0xff]  ;;  %v292_v50 = vld [vmem:[%s1840_s26 + $0x258] sm:$0xff] }
  0x61   : > { %402 = vmatprep.subr.mxu0 %v1705_v0  ;;  %1375 = vmatprep.subr.mxu1 %v1705_v0  ;;  %v225_v51 = vld [vmem:[%s1840_s26 + $0x40] sm:$0xff]  ;;  %v228_v52 = vld [vmem:[%s1840_s26 + $0x58] sm:$0xff]  ;;  %v291_v53 = vld [vmem:[%s1840_s26 + $0x250] sm:$0xff] }
  0x62   : > { %403 = vmatpush1.msra.mxu0 %v354_v9  ;;  %1407 = vmatpush1.msra.mxu1 %v354_v9  ;;  %v294_v54 = vld [vmem:[%s1840_s26 + $0x268] sm:$0xff]  ;;  %v227_v55 = vld [vmem:[%s1840_s26 + $0x50] sm:$0xff]  ;;  %v293_v57 = vld [vmem:[%s1840_s26 + $0x260] sm:$0xff] }
  0x63   : > { %404 = vmatprep.subr.mxu0 %v1705_v0  ;;  %1376 = vmatprep.subr.mxu1 %v1705_v0  ;;  %v230_v56 = vld [vmem:[%s1840_s26 + $0x68] sm:$0xff]  ;;  %v296_v58 = vld [vmem:[%s1840_s26 + $0x278] sm:$0xff]  ;;  %v229_v59 = vld [vmem:[%s1840_s26 + $0x60] sm:$0xff] }
  0x64   : > { %405 = vmatpush1.msra.mxu0 %v353_v10  ;;  %1408 = vmatpush1.msra.mxu1 %v353_v10  ;;  %v232_v60 = vld [vmem:[%s1840_s26 + $0x78] sm:$0xff]  ;;  %v295_v61 = vld [vmem:[%s1840_s26 + $0x270] sm:$0xff]  ;;  %v298_v62 = vld [vmem:[%s1840_s26 + $0x288] sm:$0xff] }
  0x65   : > { %406 = vmatprep.subr.mxu0 %v1705_v0  ;;  %1377 = vmatprep.subr.mxu1 %v1705_v0  ;;  %v231_v63 = vld [vmem:[%s1840_s26 + $0x70] sm:$0xff]  ;;  %v297_v1 = vld [vmem:[%s1840_s26 + $0x280] sm:$0xff]  ;;  %v300_v2 = vld [vmem:[%s1840_s26 + $0x298] sm:$0xff] }
  0x66   : > { %407 = vmatpush1.msra.mxu0 %v352_v11  ;;  %1409 = vmatpush1.msra.mxu1 %v352_v11  ;;  %v233_v3 = vld [vmem:[%s1840_s26 + $0x80] sm:$0xff]  ;;  %v236_v4 = vld [vmem:[%s1840_s26 + $0x98] sm:$0xff]  ;;  %v299_v5 = vld [vmem:[%s1840_s26 + $0x290] sm:$0xff] }
  0x67   : > { %408 = vmatprep.subr.mxu0 %v1705_v0  ;;  %1378 = vmatprep.subr.mxu1 %v1705_v0  ;;  %v302_v6 = vld [vmem:[%s1840_s26 + $0x2a8] sm:$0xff]  ;;  %v235_v7 = vld [vmem:[%s1840_s26 + $0x90] sm:$0xff]  ;;  %v301_v9 = vld [vmem:[%s1840_s26 + $0x2a0] sm:$0xff] }
  0x68   : > { %409 = vmatpush1.msra.mxu0 %v351_v12  ;;  %1410 = vmatpush1.msra.mxu1 %v351_v12  ;;  %v238_v8 = vld [vmem:[%s1840_s26 + $0xa8] sm:$0xff]  ;;  %v304_v10 = vld [vmem:[%s1840_s26 + $0x2b8] sm:$0xff]  ;;  %v237_v11 = vld [vmem:[%s1840_s26 + $0xa0] sm:$0xff] }
  0x69   : > { %410 = vmatprep.subr.mxu0 %v1705_v0  ;;  %1379 = vmatprep.subr.mxu1 %v1705_v0  ;;  %v240_v12 = vld [vmem:[%s1840_s26 + $0xb8] sm:$0xff] }
  0x6a   : > { %411 = vmatpush1.msra.mxu0 %v350_v13  ;;  %1411 = vmatpush1.msra.mxu1 %v350_v13  ;;  %v303_v13 = vld [vmem:[%s1840_s26 + $0x2b0] sm:$0xff] }
  0x6b   : > { %412 = vmatprep.subr.mxu0 %v1705_v0  ;;  %1380 = vmatprep.subr.mxu1 %v1705_v0 }
  0x6c   : > { %413 = vmatpush1.msra.mxu0 %v349_v14  ;;  %1412 = vmatpush1.msra.mxu1 %v349_v14  ;;  %v306_v14 = vld [vmem:[%s1840_s26 + $0x2c8] sm:$0xff] }
  0x6d   : > { %414 = vmatprep.subr.mxu0 %v1705_v0  ;;  %1381 = vmatprep.subr.mxu1 %v1705_v0 }
  0x6e   : > { %415 = vmatpush1.msra.mxu0 %v348_v15  ;;  %1413 = vmatpush1.msra.mxu1 %v348_v15  ;;  %v239_v15 = vld [vmem:[%s1840_s26 + $0xb0] sm:$0xff] }
  0x6f   : > { %416 = vmatprep.subr.mxu0 %v1705_v0  ;;  %1382 = vmatprep.subr.mxu1 %v1705_v0 }
  0x70   : > { %417 = vmatpush1.msra.mxu0 %v347_v16  ;;  %1414 = vmatpush1.msra.mxu1 %v347_v16  ;;  %v242_v16 = vld [vmem:[%s1840_s26 + $0xc8] sm:$0xff] }
  0x71   : > { %418 = vmatprep.subr.mxu0 %v1705_v0  ;;  %1383 = vmatprep.subr.mxu1 %v1705_v0 }
  0x72   : > { %419 = vmatpush2.msra.mxu0 %v378_v17  ;;  %1415 = vmatpush2.msra.mxu1 %v378_v17  ;;  %v305_v17 = vld [vmem:[%s1840_s26 + $0x2c0] sm:$0xff] }
  0x73   : > { %420 = vmatprep.subr.mxu0 %v1705_v0  ;;  %1384 = vmatprep.subr.mxu1 %v1705_v0 }
  0x74   : > { %421 = vmatpush2.msra.mxu0 %v377_v18  ;;  %1416 = vmatpush2.msra.mxu1 %v377_v18  ;;  %v308_v18 = vld [vmem:[%s1840_s26 + $0x2d8] sm:$0xff] }
  0x75   : > { %422 = vmatprep.subr.mxu0 %v1705_v0  ;;  %1385 = vmatprep.subr.mxu1 %v1705_v0 }
  0x76   : > { %423 = vmatpush2.msra.mxu0 %v376_v19  ;;  %1417 = vmatpush2.msra.mxu1 %v376_v19  ;;  %v241_v19 = vld [vmem:[%s1840_s26 + $0xc0] sm:$0xff] }
  0x77   : > { %424 = vmatprep.subr.mxu0 %v1705_v0  ;;  %1386 = vmatprep.subr.mxu1 %v1705_v0 }
  0x78   : > { %425 = vmatpush2.msra.mxu0 %v375_v20  ;;  %1418 = vmatpush2.msra.mxu1 %v375_v20  ;;  %v244_v20 = vld [vmem:[%s1840_s26 + $0xd8] sm:$0xff] }
  0x79   : > { %426 = vmatprep.subr.mxu0 %v1705_v0  ;;  %1387 = vmatprep.subr.mxu1 %v1705_v0 }
  0x7a   : > { %427 = vmatpush2.msra.mxu0 %v374_v21  ;;  %1419 = vmatpush2.msra.mxu1 %v374_v21  ;;  %v307_v21 = vld [vmem:[%s1840_s26 + $0x2d0] sm:$0xff] }
  0x7b   : > { %428 = vmatprep.subr.mxu0 %v1705_v0  ;;  %1388 = vmatprep.subr.mxu1 %v1705_v0 }
  0x7c   : > { %429 = vmatpush2.msra.mxu0 %v373_v22  ;;  %1420 = vmatpush2.msra.mxu1 %v373_v22  ;;  %v310_v22 = vld [vmem:[%s1840_s26 + $0x2e8] sm:$0xff] }
  0x7d   : > { %430 = vmatprep.subr.mxu0 %v1705_v0  ;;  %1389 = vmatprep.subr.mxu1 %v1705_v0 }
  0x7e   : > { %431 = vmatpush2.msra.mxu0 %v372_v23  ;;  %1421 = vmatpush2.msra.mxu1 %v372_v23  ;;  %v243_v23 = vld [vmem:[%s1840_s26 + $0xd0] sm:$0xff] }
  0x7f   : > { %432 = vmatprep.subr.mxu0 %v1705_v0  ;;  %1390 = vmatprep.subr.mxu1 %v1705_v0 }
  0x80   : > { %433 = vmatpush2.msra.mxu0 %v371_v24  ;;  %1422 = vmatpush2.msra.mxu1 %v371_v24  ;;  %v246_v24 = vld [vmem:[%s1840_s26 + $0xe8] sm:$0xff] }
  0x81   : > { %434 = vmatprep.subr.mxu0 %v1705_v0  ;;  %1391 = vmatprep.subr.mxu1 %v1705_v0 }
  0x82   : > { %435 = vmatpush2.msra.mxu0 %v370_v25  ;;  %1423 = vmatpush2.msra.mxu1 %v370_v25  ;;  %v309_v25 = vld [vmem:[%s1840_s26 + $0x2e0] sm:$0xff] }
  0x83   : > { %436 = vmatprep.subr.mxu0 %v1705_v0  ;;  %1392 = vmatprep.subr.mxu1 %v1705_v0 }
  0x84   : > { %437 = vmatpush2.msra.mxu0 %v369_v26  ;;  %1424 = vmatpush2.msra.mxu1 %v369_v26  ;;  %v312_v26 = vld [vmem:[%s1840_s26 + $0x2f8] sm:$0xff] }
  0x85   : > { %438 = vmatprep.subr.mxu0 %v1705_v0  ;;  %1393 = vmatprep.subr.mxu1 %v1705_v0 }
  0x86   : > { %439 = vmatpush2.msra.mxu0 %v368_v27  ;;  %1425 = vmatpush2.msra.mxu1 %v368_v27  ;;  %v245_v27 = vld [vmem:[%s1840_s26 + $0xe0] sm:$0xff] }
  0x87   : > { %440 = vmatprep.subr.mxu0 %v1705_v0  ;;  %1394 = vmatprep.subr.mxu1 %v1705_v0 }
  0x88   : > { %441 = vmatpush2.msra.mxu0 %v367_v28  ;;  %1426 = vmatpush2.msra.mxu1 %v367_v28  ;;  %v248_v28 = vld [vmem:[%s1840_s26 + $0xf8] sm:$0xff] }
  0x89   : > { %442 = vmatprep.subr.mxu0 %v1705_v0  ;;  %1395 = vmatprep.subr.mxu1 %v1705_v0 }
  0x8a   : > { %443 = vmatpush2.msra.mxu0 %v366_v29  ;;  %1427 = vmatpush2.msra.mxu1 %v366_v29  ;;  %v311_v29 = vld [vmem:[%s1840_s26 + $0x2f0] sm:$0xff] }
  0x8b   : > { %444 = vmatprep.subr.mxu0 %v1705_v0  ;;  %1396 = vmatprep.subr.mxu1 %v1705_v0 }
  0x8c   : > { %445 = vmatpush2.msra.mxu0 %v365_v30  ;;  %1428 = vmatpush2.msra.mxu1 %v365_v30  ;;  %v314_v30 = vld [vmem:[%s1840_s26 + $0x308] sm:$0xff] }
  0x8d   : > { %446 = vmatprep.subr.mxu0 %v1705_v0  ;;  %1397 = vmatprep.subr.mxu1 %v1705_v0 }
  0x8e   : > { %447 = vmatpush2.msra.mxu0 %v364_v31  ;;  %1429 = vmatpush2.msra.mxu1 %v364_v31  ;;  %v247_v31 = vld [vmem:[%s1840_s26 + $0xf0] sm:$0xff] }
  0x8f   : > { %448 = vmatprep.subr.mxu0 %v1705_v0  ;;  %450 = vmatprep.mubr.f32.mxu0 %v218_v32  ;;  %v250_v32 = vld [vmem:[%s1840_s26 + $0x108] sm:$0xff] }
  0x90   : > { %449 = vmatpush2.msra.mxu0 %v363_v33  ;;  %1398 = vmatprep.subr.mxu1 %v1705_v0  ;;  %v234_v0 = vld [vmem:[%s1840_s26 + $0x88] sm:$0xff] }
  0x91   : > { %451 = vmatmul.mubr.f32.vlgmr.msra.gmra.mxu0 %v217_v34  ;;  %1430 = vmatpush2.msra.mxu1 %v363_v33  ;;  %v313_v33 = vld [vmem:[%s1840_s26 + $0x300] sm:$0xff]  ;;  %v316_v34 = vld [vmem:[%s1840_s26 + $0x318] sm:$0xff] }
  0x92   : > { %615 = vmatprep.mubr.f32.mxu1 %v284_v35  ;;  %455 = vmatprep.mubr.f32.mxu0 %v220_v36  ;;  %v249_v35 = vld [vmem:[%s1840_s26 + $0x100] sm:$0xff]  ;;  %v252_v36 = vld [vmem:[%s1840_s26 + $0x118] sm:$0xff] }
  0x93   : > { %616 = vmatmul.mubr.f32.vlgmr.msra.gmra.mxu1 %v283_v37  ;;  %v315_v37 = vld [vmem:[%s1840_s26 + $0x310] sm:$0xff] }
  0x94   : > { %620 = vmatprep.mubr.f32.mxu1 %v286_v38  ;;  %v318_v38 = vld [vmem:[%s1840_s26 + $0x328] sm:$0xff] }
  0x95   : > { %456 = vmatmul.mubr.f32.gmra.mxu0 %v219_v39  ;;  %v251_v39 = vld [vmem:[%s1840_s26 + $0x110] sm:$0xff] }
  0x96   : > { %460 = vmatprep.mubr.f32.mxu0 %v222_v40  ;;  %v254_v40 = vld [vmem:[%s1840_s26 + $0x128] sm:$0xff] }
  0x97   : > { %621 = vmatmul.mubr.f32.gmra.mxu1 %v285_v41  ;;  %v317_v41 = vld [vmem:[%s1840_s26 + $0x320] sm:$0xff] }
  0x98   : > { %625 = vmatprep.mubr.f32.mxu1 %v288_v42  ;;  %v320_v42 = vld [vmem:[%s1840_s26 + $0x338] sm:$0xff] }
  0x99   : > { %461 = vmatmul.mubr.f32.gmra.mxu0 %v221_v43  ;;  %v253_v43 = vld [vmem:[%s1840_s26 + $0x120] sm:$0xff] }
  0x9a   : > { %465 = vmatprep.mubr.f32.mxu0 %v224_v44  ;;  %v256_v44 = vld [vmem:[%s1840_s26 + $0x138] sm:$0xff] }
  0x9b   : > { %626 = vmatmul.mubr.f32.gmra.mxu1 %v287_v45  ;;  %v319_v45 = vld [vmem:[%s1840_s26 + $0x330] sm:$0xff] }
  0x9c   : > { %630 = vmatprep.mubr.f32.mxu1 %v290_v46  ;;  %v322_v46 = vld [vmem:[%s1840_s26 + $0x348] sm:$0xff] }
  0x9d   : > { %466 = vmatmul.mubr.f32.gmra.mxu0 %v223_v47  ;;  %v255_v47 = vld [vmem:[%s1840_s26 + $0x130] sm:$0xff] }
  0x9e   : > { %470 = vmatprep.mubr.f32.mxu0 %v226_v48  ;;  %v258_v48 = vld [vmem:[%s1840_s26 + $0x148] sm:$0xff] }
  0x9f   : > { %631 = vmatmul.mubr.f32.gmra.mxu1 %v289_v49  ;;  %v321_v49 = vld [vmem:[%s1840_s26 + $0x340] sm:$0xff] }
  0xa0   : > { %635 = vmatprep.mubr.f32.mxu1 %v292_v50  ;;  %v324_v50 = vld [vmem:[%s1840_s26 + $0x358] sm:$0xff] }
  0xa1   : > { %471 = vmatmul.mubr.f32.gmra.mxu0 %v225_v51  ;;  %v257_v51 = vld [vmem:[%s1840_s26 + $0x140] sm:$0xff] }
  0xa2   : > { %475 = vmatprep.mubr.f32.mxu0 %v228_v52  ;;  %v260_v52 = vld [vmem:[%s1840_s26 + $0x158] sm:$0xff] }
  0xa3   : > { %636 = vmatmul.mubr.f32.gmra.mxu1 %v291_v53  ;;  %v323_v53 = vld [vmem:[%s1840_s26 + $0x350] sm:$0xff] }
  0xa4   : > { %640 = vmatprep.mubr.f32.mxu1 %v294_v54  ;;  %v326_v54 = vld [vmem:[%s1840_s26 + $0x368] sm:$0xff] }
  0xa5   : > { %476 = vmatmul.mubr.f32.gmra.mxu0 %v227_v55  ;;  %v259_v55 = vld [vmem:[%s1840_s26 + $0x150] sm:$0xff] }
  0xa6   : > { %480 = vmatprep.mubr.f32.mxu0 %v230_v56  ;;  %v262_v56 = vld [vmem:[%s1840_s26 + $0x168] sm:$0xff] }
  0xa7   : > { %641 = vmatmul.mubr.f32.gmra.mxu1 %v293_v57  ;;  %v325_v57 = vld [vmem:[%s1840_s26 + $0x360] sm:$0xff] }
  0xa8   : > { %645 = vmatprep.mubr.f32.mxu1 %v296_v58  ;;  %v328_v58 = vld [vmem:[%s1840_s26 + $0x378] sm:$0xff] }
  0xa9   : > { %481 = vmatmul.mubr.f32.gmra.mxu0 %v229_v59  ;;  %v261_v59 = vld [vmem:[%s1840_s26 + $0x160] sm:$0xff] }
  0xaa   : > { %485 = vmatprep.mubr.f32.mxu0 %v232_v60  ;;  %v264_v60 = vld [vmem:[%s1840_s26 + $0x178] sm:$0xff] }
  0xab   : > { %646 = vmatmul.mubr.f32.gmra.mxu1 %v295_v61  ;;  %v327_v61 = vld [vmem:[%s1840_s26 + $0x370] sm:$0xff] }
  0xac   : > { %650 = vmatprep.mubr.f32.mxu1 %v298_v62  ;;  %v330_v62 = vld [vmem:[%s1840_s26 + $0x388] sm:$0xff] }
  0xad   : > { %486 = vmatmul.mubr.f32.gmra.mxu0 %v231_v63  ;;  %v263_v63 = vld [vmem:[%s1840_s26 + $0x170] sm:$0xff] }
  0xae   : > { %490 = vmatprep.mubr.f32.mxu0 %v234_v0  ;;  %v266_v0 = vld [vmem:[%s1840_s26 + $0x188] sm:$0xff] }
  0xaf   : > { %651 = vmatmul.mubr.f32.gmra.mxu1 %v297_v1  ;;  %v329_v1 = vld [vmem:[%s1840_s26 + $0x380] sm:$0xff] }
  0xb0   : > { %655 = vmatprep.mubr.f32.mxu1 %v300_v2  ;;  %v332_v2 = vld [vmem:[%s1840_s26 + $0x398] sm:$0xff] }
  0xb1   : > { %491 = vmatmul.mubr.f32.gmra.mxu0 %v233_v3  ;;  %v265_v3 = vld [vmem:[%s1840_s26 + $0x180] sm:$0xff] }
  0xb2   : > { %495 = vmatprep.mubr.f32.mxu0 %v236_v4  ;;  %v268_v4 = vld [vmem:[%s1840_s26 + $0x198] sm:$0xff] }
  0xb3   : > { %656 = vmatmul.mubr.f32.gmra.mxu1 %v299_v5  ;;  %v331_v5 = vld [vmem:[%s1840_s26 + $0x390] sm:$0xff] }
  0xb4   : > { %660 = vmatprep.mubr.f32.mxu1 %v302_v6  ;;  %v334_v6 = vld [vmem:[%s1840_s26 + $0x3a8] sm:$0xff] }
  0xb5   : > { %496 = vmatmul.mubr.f32.gmra.mxu0 %v235_v7  ;;  %v267_v7 = vld [vmem:[%s1840_s26 + $0x190] sm:$0xff] }
  0xb6   : > { %500 = vmatprep.mubr.f32.mxu0 %v238_v8  ;;  %v270_v8 = vld [vmem:[%s1840_s26 + $0x1a8] sm:$0xff] }
  0xb7   : > { %661 = vmatmul.mubr.f32.gmra.mxu1 %v301_v9  ;;  %v333_v9 = vld [vmem:[%s1840_s26 + $0x3a0] sm:$0xff] }
  0xb8   : > { %665 = vmatprep.mubr.f32.mxu1 %v304_v10  ;;  %v336_v10 = vld [vmem:[%s1840_s26 + $0x3b8] sm:$0xff] }
  0xb9   : > { %501 = vmatmul.mubr.f32.gmra.mxu0 %v237_v11  ;;  %v269_v11 = vld [vmem:[%s1840_s26 + $0x1a0] sm:$0xff] }
  0xba   : > { %505 = vmatprep.mubr.f32.mxu0 %v240_v12  ;;  %v272_v12 = vld [vmem:[%s1840_s26 + $0x1b8] sm:$0xff] }
  0xbb   : > { %666 = vmatmul.mubr.f32.gmra.mxu1 %v303_v13  ;;  %v335_v13 = vld [vmem:[%s1840_s26 + $0x3b0] sm:$0xff] }
  0xbc   : > { %670 = vmatprep.mubr.f32.mxu1 %v306_v14  ;;  %v338_v14 = vld [vmem:[%s1840_s26 + $0x3c8] sm:$0xff] }
  0xbd   : > { %506 = vmatmul.mubr.f32.gmra.mxu0 %v239_v15  ;;  %v271_v15 = vld [vmem:[%s1840_s26 + $0x1b0] sm:$0xff] }
  0xbe   : > { %510 = vmatprep.mubr.f32.mxu0 %v242_v16  ;;  %v274_v16 = vld [vmem:[%s1840_s26 + $0x1c8] sm:$0xff] }
  0xbf   : > { %671 = vmatmul.mubr.f32.gmra.mxu1 %v305_v17  ;;  %v337_v17 = vld [vmem:[%s1840_s26 + $0x3c0] sm:$0xff] }
  0xc0   : > { %675 = vmatprep.mubr.f32.mxu1 %v308_v18  ;;  %v340_v18 = vld [vmem:[%s1840_s26 + $0x3d8] sm:$0xff] }
  0xc1   : > { %511 = vmatmul.mubr.f32.gmra.mxu0 %v241_v19  ;;  %v273_v19 = vld [vmem:[%s1840_s26 + $0x1c0] sm:$0xff] }
  0xc2   : > { %515 = vmatprep.mubr.f32.mxu0 %v244_v20  ;;  %v276_v20 = vld [vmem:[%s1840_s26 + $0x1d8] sm:$0xff] }
  0xc3   : > { %676 = vmatmul.mubr.f32.gmra.mxu1 %v307_v21  ;;  %v339_v21 = vld [vmem:[%s1840_s26 + $0x3d0] sm:$0xff] }
  0xc4   : > { %680 = vmatprep.mubr.f32.mxu1 %v310_v22  ;;  %v342_v22 = vld [vmem:[%s1840_s26 + $0x3e8] sm:$0xff] }
  0xc5   : > { %516 = vmatmul.mubr.f32.gmra.mxu0 %v243_v23  ;;  %v275_v23 = vld [vmem:[%s1840_s26 + $0x1d0] sm:$0xff] }
  0xc6   : > { %520 = vmatprep.mubr.f32.mxu0 %v246_v24  ;;  %v278_v24 = vld [vmem:[%s1840_s26 + $0x1e8] sm:$0xff] }
  0xc7   : > { %681 = vmatmul.mubr.f32.gmra.mxu1 %v309_v25  ;;  %v341_v25 = vld [vmem:[%s1840_s26 + $0x3e0] sm:$0xff] }
  0xc8   : > { %685 = vmatprep.mubr.f32.mxu1 %v312_v26  ;;  %v344_v26 = vld [vmem:[%s1840_s26 + $0x3f8] sm:$0xff] }
  0xc9   : > { %521 = vmatmul.mubr.f32.gmra.mxu0 %v245_v27  ;;  %v277_v27 = vld [vmem:[%s1840_s26 + $0x1e0] sm:$0xff] }
  0xca   : > { %525 = vmatprep.mubr.f32.mxu0 %v248_v28  ;;  %v280_v28 = vld [vmem:[%s1840_s26 + $0x1f8] sm:$0xff] }
  0xcb   : > { %686 = vmatmul.mubr.f32.gmra.mxu1 %v311_v29  ;;  %v343_v29 = vld [vmem:[%s1840_s26 + $0x3f0] sm:$0xff] }
  0xcc   : > { %690 = vmatprep.mubr.f32.mxu1 %v314_v30  ;;  %v346_v30 = vld [vmem:[%s1840_s26 + $0x408] sm:$0xff] }
  0xcd   : > { %526 = vmatmul.mubr.f32.gmra.mxu0 %v247_v31  ;;  %v279_v31 = vld [vmem:[%s1840_s26 + $0x1f0] sm:$0xff] }
  0xce   : > { %530 = vmatprep.mubr.f32.mxu0 %v250_v32  ;;  %v282_v32 = vld [vmem:[%s1840_s26 + $0x208] sm:$0xff] }
  0xcf   : > { %691 = vmatmul.mubr.f32.gmra.mxu1 %v313_v33  ;;  %v345_v33 = vld [vmem:[%s1840_s26 + $0x400] sm:$0xff] }
  0xd0   : > { %695 = vmatprep.mubr.f32.mxu1 %v316_v34  ;;  %v281_v34 = vld [vmem:[%s1840_s26 + $0x200] sm:$0xff]  ;;  %s1363_s26 = smul.u32 (%p2559_p5), 520, %s1745_s16 }
  0xd1   : > { %531 = vmatmul.mubr.f32.gmra.mxu0 %v249_v35  ;;  %v2141_v35 = vld [vmem:[#allocation4] ss:$0 sm:$0xff] }
  0xd2   : > { %535 = vmatprep.mubr.f32.mxu0 %v252_v36  ;;  %s2347_s5 = scalar_lea.vmem (%p2559_p5), %s2552_s3, %s1363_s26  }
  0xd3   : > { %696 = vmatmul.mubr.f32.gmra.mxu1 %v315_v37 }
  0xd4   : > { %700 = vmatprep.mubr.f32.mxu1 %v318_v38 }
  0xd5   : > { %536 = vmatmul.mubr.f32.gmra.mxu0 %v251_v39 }
  0xd6   : > { %540 = vmatprep.mubr.f32.mxu0 %v254_v40 }
  0xd7   : > { %701 = vmatmul.mubr.f32.gmra.mxu1 %v317_v41 }
  0xd8   : > { %705 = vmatprep.mubr.f32.mxu1 %v320_v42 }
  0xd9   : > { %541 = vmatmul.mubr.f32.gmra.mxu0 %v253_v43 }
  0xda   : > { %545 = vmatprep.mubr.f32.mxu0 %v256_v44 }
  0xdb   : > { %706 = vmatmul.mubr.f32.gmra.mxu1 %v319_v45 }
  0xdc   : > { %710 = vmatprep.mubr.f32.mxu1 %v322_v46 }
  0xdd   : > { %546 = vmatmul.mubr.f32.gmra.mxu0 %v255_v47 }
  0xde   : > { %550 = vmatprep.mubr.f32.mxu0 %v258_v48 }
  0xdf   : > { %711 = vmatmul.mubr.f32.gmra.mxu1 %v321_v49 }
  0xe0   : > { %715 = vmatprep.mubr.f32.mxu1 %v324_v50 }
  0xe1   : > { %551 = vmatmul.mubr.f32.gmra.mxu0 %v257_v51 }
  0xe2   : > { %555 = vmatprep.mubr.f32.mxu0 %v260_v52 }
  0xe3   : > { %716 = vmatmul.mubr.f32.gmra.mxu1 %v323_v53 }
  0xe4   : > { %720 = vmatprep.mubr.f32.mxu1 %v326_v54 }
  0xe5   : > { %556 = vmatmul.mubr.f32.gmra.mxu0 %v259_v55 }
  0xe6   : > { %560 = vmatprep.mubr.f32.mxu0 %v262_v56 }
  0xe7   : > { %721 = vmatmul.mubr.f32.gmra.mxu1 %v325_v57 }
  0xe8   : > { %725 = vmatprep.mubr.f32.mxu1 %v328_v58 }
  0xe9   : > { %561 = vmatmul.mubr.f32.gmra.mxu0 %v261_v59 }
  0xea   : > { %565 = vmatprep.mubr.f32.mxu0 %v264_v60 }
  0xeb   : > { %726 = vmatmul.mubr.f32.gmra.mxu1 %v327_v61 }
  0xec   : > { %730 = vmatprep.mubr.f32.mxu1 %v330_v62 }
  0xed   : > { %566 = vmatmul.mubr.f32.gmra.mxu0 %v263_v63 }
  0xee   : > { %570 = vmatprep.mubr.f32.mxu0 %v266_v0 }
  0xef   : > { %731 = vmatmul.mubr.f32.gmra.mxu1 %v329_v1 }
  0xf0   : > { %735 = vmatprep.mubr.f32.mxu1 %v332_v2 }
  0xf1   : > { %571 = vmatmul.mubr.f32.gmra.mxu0 %v265_v3 }
  0xf2   : > { %575 = vmatprep.mubr.f32.mxu0 %v268_v4 }
  0xf3   : > { %736 = vmatmul.mubr.f32.gmra.mxu1 %v331_v5 }
  0xf4   : > { %740 = vmatprep.mubr.f32.mxu1 %v334_v6 }
  0xf5   : > { %576 = vmatmul.mubr.f32.gmra.mxu0 %v267_v7 }
  0xf6   : > { %580 = vmatprep.mubr.f32.mxu0 %v270_v8 }
  0xf7   : > { %741 = vmatmul.mubr.f32.gmra.mxu1 %v333_v9 }
  0xf8   : > { %745 = vmatprep.mubr.f32.mxu1 %v336_v10 }
  0xf9   : > { %581 = vmatmul.mubr.f32.gmra.mxu0 %v269_v11 }
  0xfa   : > { %585 = vmatprep.mubr.f32.mxu0 %v272_v12 }
  0xfb   : > { %746 = vmatmul.mubr.f32.gmra.mxu1 %v335_v13 }
  0xfc   : > { %750 = vmatprep.mubr.f32.mxu1 %v338_v14 }
  0xfd   : > { %586 = vmatmul.mubr.f32.gmra.mxu0 %v271_v15 }
  0xfe   : > { %590 = vmatprep.mubr.f32.mxu0 %v274_v16 }
  0xff   : > { %751 = vmatmul.mubr.f32.gmra.mxu1 %v337_v17 }
 0x100   : > { %755 = vmatprep.mubr.f32.mxu1 %v340_v18 }
 0x101   : > { %591 = vmatmul.mubr.f32.gmra.mxu0 %v273_v19 }
 0x102   : > { %595 = vmatprep.mubr.f32.mxu0 %v276_v20 }
 0x103   : > { %756 = vmatmul.mubr.f32.gmra.mxu1 %v339_v21 }
 0x104   : > { %760 = vmatprep.mubr.f32.mxu1 %v342_v22 }
 0x105   : > { %596 = vmatmul.mubr.f32.gmra.mxu0 %v275_v23 }
 0x106   : > { %600 = vmatprep.mubr.f32.mxu0 %v278_v24 }
 0x107   : > { %761 = vmatmul.mubr.f32.gmra.mxu1 %v341_v25 }
 0x108   : > { %765 = vmatprep.mubr.f32.mxu1 %v344_v26 }
 0x109   : > { %601 = vmatmul.mubr.f32.gmra.mxu0 %v277_v27 }
 0x10a   : > { %605 = vmatprep.mubr.f32.mxu0 %v280_v28 }
 0x10b   : > { %766 = vmatmul.mubr.f32.gmra.mxu1 %v343_v29 }
 0x10c   : > { %770 = vmatprep.mubr.f32.mxu1 %v346_v30 }
 0x10d   : > { %606 = vmatmul.mubr.f32.gmra.mxu0 %v279_v31 }
 0x10e   : > { %610 = vmatprep.mubr.f32.mxu0 %v282_v32 }
 0x10f   : > { %771 = vmatmul.mubr.f32.gmra.mxu1 %v345_v33 }
 0x111   : > { %611 = vmatmul.mubr.f32.gmra.mxu0 %v281_v34 }
 0x151   : > { %v452_v36 = vpop.f32.mrf.mxu0 }
 0x152   : > { %v453_v37 = vadd.f32 %v2141_v35, %v452_v36 }
 0x153   : > { %v454_v38 = vpop.f32.mrf.mxu0  ;;  %v617_v39 = vpop.f32.mrf.mxu1 }
 0x154   : > { %777 = vst.msk [vmem:[%s2144_s15] sm:$0xff] %vm776_vm0, %v453_v37  ;;  %v618_v40 = vadd.f32 %v2141_v35, %v617_v39 }
 0x155   : > { %v457_v41 = vpop.f32.mrf.mxu0  ;;  %v619_v42 = vpop.f32.mrf.mxu1 }
 0x156   : > { %810 = vst.msk [vmem:[%s2144_s15 + $0x108] sm:$0xff] %vm776_vm0, %v618_v40  ;;  %v458_v43 = vadd.f32 %v2141_v35, %v457_v41 }
 0x157   : > { %v459_v44 = vpop.f32.mrf.mxu0  ;;  %v622_v45 = vpop.f32.mrf.mxu1 }
 0x158   : > { %778 = vst.msk [vmem:[%s2144_s15 + $0x8] sm:$0xff] %vm776_vm0, %v458_v43  ;;  %v623_v46 = vadd.f32 %v2141_v35, %v622_v45 }
 0x159   : > { %v462_v47 = vpop.f32.mrf.mxu0  ;;  %v624_v48 = vpop.f32.mrf.mxu1 }
 0x15a   : > { %811 = vst.msk [vmem:[%s2144_s15 + $0x110] sm:$0xff] %vm776_vm0, %v623_v46  ;;  %v463_v49 = vadd.f32 %v2141_v35, %v462_v47 }
 0x15b   : > { %v464_v50 = vpop.f32.mrf.mxu0  ;;  %v627_v51 = vpop.f32.mrf.mxu1 }
 0x15c   : > { %779 = vst.msk [vmem:[%s2144_s15 + $0x10] sm:$0xff] %vm776_vm0, %v463_v49  ;;  %v628_v52 = vadd.f32 %v2141_v35, %v627_v51 }
 0x15d   : > { %v467_v53 = vpop.f32.mrf.mxu0  ;;  %v629_v54 = vpop.f32.mrf.mxu1 }
 0x15e   : > { %812 = vst.msk [vmem:[%s2144_s15 + $0x118] sm:$0xff] %vm776_vm0, %v628_v52  ;;  %v468_v55 = vadd.f32 %v2141_v35, %v467_v53 }
 0x15f   : > { %v469_v56 = vpop.f32.mrf.mxu0  ;;  %v632_v57 = vpop.f32.mrf.mxu1 }
 0x160   : > { %780 = vst.msk [vmem:[%s2144_s15 + $0x18] sm:$0xff] %vm776_vm0, %v468_v55  ;;  %v633_v58 = vadd.f32 %v2141_v35, %v632_v57 }
 0x161   : > { %v472_v59 = vpop.f32.mrf.mxu0  ;;  %v634_v60 = vpop.f32.mrf.mxu1 }
 0x162   : > { %813 = vst.msk [vmem:[%s2144_s15 + $0x120] sm:$0xff] %vm776_vm0, %v633_v58  ;;  %v473_v61 = vadd.f32 %v2141_v35, %v472_v59 }
 0x163   : > { %v474_v62 = vpop.f32.mrf.mxu0  ;;  %v637_v63 = vpop.f32.mrf.mxu1 }
 0x164   : > { %781 = vst.msk [vmem:[%s2144_s15 + $0x20] sm:$0xff] %vm776_vm0, %v473_v61  ;;  %v638_v0 = vadd.f32 %v2141_v35, %v637_v63 }
 0x165   : > { %v477_v1 = vpop.f32.mrf.mxu0  ;;  %v639_v2 = vpop.f32.mrf.mxu1 }
 0x166   : > { %814 = vst.msk [vmem:[%s2144_s15 + $0x128] sm:$0xff] %vm776_vm0, %v638_v0  ;;  %v478_v3 = vadd.f32 %v2141_v35, %v477_v1 }
 0x167   : > { %v479_v4 = vpop.f32.mrf.mxu0  ;;  %v642_v5 = vpop.f32.mrf.mxu1 }
 0x168   : > { %782 = vst.msk [vmem:[%s2144_s15 + $0x28] sm:$0xff] %vm776_vm0, %v478_v3  ;;  %v643_v6 = vadd.f32 %v2141_v35, %v642_v5 }
 0x169   : > { %v482_v7 = vpop.f32.mrf.mxu0  ;;  %v644_v8 = vpop.f32.mrf.mxu1 }
 0x16a   : > { %815 = vst.msk [vmem:[%s2144_s15 + $0x130] sm:$0xff] %vm776_vm0, %v643_v6  ;;  %v483_v9 = vadd.f32 %v2141_v35, %v482_v7 }
 0x16b   : > { %v484_v10 = vpop.f32.mrf.mxu0  ;;  %v647_v11 = vpop.f32.mrf.mxu1 }
 0x16c   : > { %783 = vst.msk [vmem:[%s2144_s15 + $0x30] sm:$0xff] %vm776_vm0, %v483_v9  ;;  %v648_v12 = vadd.f32 %v2141_v35, %v647_v11 }
 0x16d   : > { %v487_v13 = vpop.f32.mrf.mxu0  ;;  %v649_v14 = vpop.f32.mrf.mxu1 }
 0x16e   : > { %816 = vst.msk [vmem:[%s2144_s15 + $0x138] sm:$0xff] %vm776_vm0, %v648_v12  ;;  %v488_v15 = vadd.f32 %v2141_v35, %v487_v13 }
 0x16f   : > { %v489_v16 = vpop.f32.mrf.mxu0  ;;  %v652_v17 = vpop.f32.mrf.mxu1 }
 0x170   : > { %784 = vst.msk [vmem:[%s2144_s15 + $0x38] sm:$0xff] %vm776_vm0, %v488_v15  ;;  %v653_v18 = vadd.f32 %v2141_v35, %v652_v17 }
 0x171   : > { %v492_v19 = vpop.f32.mrf.mxu0  ;;  %v654_v20 = vpop.f32.mrf.mxu1 }
 0x172   : > { %817 = vst.msk [vmem:[%s2144_s15 + $0x140] sm:$0xff] %vm776_vm0, %v653_v18  ;;  %v493_v21 = vadd.f32 %v2141_v35, %v492_v19 }
 0x173   : > { %v494_v22 = vpop.f32.mrf.mxu0  ;;  %v657_v23 = vpop.f32.mrf.mxu1 }
 0x174   : > { %785 = vst.msk [vmem:[%s2144_s15 + $0x40] sm:$0xff] %vm776_vm0, %v493_v21  ;;  %v658_v24 = vadd.f32 %v2141_v35, %v657_v23 }
 0x175   : > { %v497_v25 = vpop.f32.mrf.mxu0  ;;  %v659_v26 = vpop.f32.mrf.mxu1 }
 0x176   : > { %818 = vst.msk [vmem:[%s2144_s15 + $0x148] sm:$0xff] %vm776_vm0, %v658_v24  ;;  %v498_v27 = vadd.f32 %v2141_v35, %v497_v25 }
 0x177   : > { %v499_v28 = vpop.f32.mrf.mxu0  ;;  %v662_v29 = vpop.f32.mrf.mxu1 }
 0x178   : > { %786 = vst.msk [vmem:[%s2144_s15 + $0x48] sm:$0xff] %vm776_vm0, %v498_v27  ;;  %v663_v30 = vadd.f32 %v2141_v35, %v662_v29 }
 0x179   : > { %v502_v31 = vpop.f32.mrf.mxu0  ;;  %v664_v32 = vpop.f32.mrf.mxu1 }
 0x17a   : > { %819 = vst.msk [vmem:[%s2144_s15 + $0x150] sm:$0xff] %vm776_vm0, %v663_v30  ;;  %v503_v33 = vadd.f32 %v2141_v35, %v502_v31 }
 0x17b   : > { %v504_v34 = vpop.f32.mrf.mxu0  ;;  %v667_v36 = vpop.f32.mrf.mxu1 }
 0x17c   : > { %787 = vst.msk [vmem:[%s2144_s15 + $0x50] sm:$0xff] %vm776_vm0, %v503_v33  ;;  %v668_v37 = vadd.f32 %v2141_v35, %v667_v36 }
 0x17d   : > { %v507_v38 = vpop.f32.mrf.mxu0  ;;  %v669_v39 = vpop.f32.mrf.mxu1 }
 0x17e   : > { %820 = vst.msk [vmem:[%s2144_s15 + $0x158] sm:$0xff] %vm776_vm0, %v668_v37  ;;  %v508_v40 = vadd.f32 %v2141_v35, %v507_v38 }
 0x17f   : > { %v509_v41 = vpop.f32.mrf.mxu0  ;;  %v672_v42 = vpop.f32.mrf.mxu1 }
 0x180   : > { %788 = vst.msk [vmem:[%s2144_s15 + $0x58] sm:$0xff] %vm776_vm0, %v508_v40  ;;  %v673_v43 = vadd.f32 %v2141_v35, %v672_v42 }
 0x181   : > { %v512_v44 = vpop.f32.mrf.mxu0  ;;  %v674_v45 = vpop.f32.mrf.mxu1 }
 0x182   : > { %821 = vst.msk [vmem:[%s2144_s15 + $0x160] sm:$0xff] %vm776_vm0, %v673_v43  ;;  %v513_v46 = vadd.f32 %v2141_v35, %v512_v44 }
 0x183   : > { %v514_v47 = vpop.f32.mrf.mxu0  ;;  %v677_v48 = vpop.f32.mrf.mxu1 }
 0x184   : > { %789 = vst.msk [vmem:[%s2144_s15 + $0x60] sm:$0xff] %vm776_vm0, %v513_v46  ;;  %v678_v49 = vadd.f32 %v2141_v35, %v677_v48 }
 0x185   : > { %v517_v50 = vpop.f32.mrf.mxu0  ;;  %v679_v51 = vpop.f32.mrf.mxu1 }
 0x186   : > { %822 = vst.msk [vmem:[%s2144_s15 + $0x168] sm:$0xff] %vm776_vm0, %v678_v49  ;;  %v518_v52 = vadd.f32 %v2141_v35, %v517_v50 }
 0x187   : > { %v519_v53 = vpop.f32.mrf.mxu0  ;;  %v682_v54 = vpop.f32.mrf.mxu1 }
 0x188   : > { %790 = vst.msk [vmem:[%s2144_s15 + $0x68] sm:$0xff] %vm776_vm0, %v518_v52  ;;  %v683_v55 = vadd.f32 %v2141_v35, %v682_v54 }
 0x189   : > { %v522_v56 = vpop.f32.mrf.mxu0  ;;  %v684_v57 = vpop.f32.mrf.mxu1 }
 0x18a   : > { %823 = vst.msk [vmem:[%s2144_s15 + $0x170] sm:$0xff] %vm776_vm0, %v683_v55  ;;  %v523_v58 = vadd.f32 %v2141_v35, %v522_v56 }
 0x18b   : > { %v524_v59 = vpop.f32.mrf.mxu0  ;;  %v687_v60 = vpop.f32.mrf.mxu1 }
 0x18c   : > { %791 = vst.msk [vmem:[%s2144_s15 + $0x70] sm:$0xff] %vm776_vm0, %v523_v58  ;;  %v688_v61 = vadd.f32 %v2141_v35, %v687_v60 }
 0x18d   : > { %v527_v62 = vpop.f32.mrf.mxu0  ;;  %v689_v63 = vpop.f32.mrf.mxu1 }
 0x18e   : > { %824 = vst.msk [vmem:[%s2144_s15 + $0x178] sm:$0xff] %vm776_vm0, %v688_v61  ;;  %v528_v0 = vadd.f32 %v2141_v35, %v527_v62 }
 0x18f   : > { %v529_v1 = vpop.f32.mrf.mxu0  ;;  %v692_v2 = vpop.f32.mrf.mxu1 }
 0x190   : > { %792 = vst.msk [vmem:[%s2144_s15 + $0x78] sm:$0xff] %vm776_vm0, %v528_v0  ;;  %v693_v3 = vadd.f32 %v2141_v35, %v692_v2 }
 0x191   : > { %v532_v4 = vpop.f32.mrf.mxu0  ;;  %v694_v5 = vpop.f32.mrf.mxu1 }
 0x192   : > { %825 = vst.msk [vmem:[%s2144_s15 + $0x180] sm:$0xff] %vm776_vm0, %v693_v3  ;;  %v533_v6 = vadd.f32 %v2141_v35, %v532_v4 }
 0x193   : > { %v534_v7 = vpop.f32.mrf.mxu0  ;;  %v697_v8 = vpop.f32.mrf.mxu1 }
 0x194   : > { %793 = vst.msk [vmem:[%s2144_s15 + $0x80] sm:$0xff] %vm776_vm0, %v533_v6  ;;  %v698_v9 = vadd.f32 %v2141_v35, %v697_v8 }
 0x195   : > { %v537_v10 = vpop.f32.mrf.mxu0  ;;  %v699_v11 = vpop.f32.mrf.mxu1 }
 0x196   : > { %826 = vst.msk [vmem:[%s2144_s15 + $0x188] sm:$0xff] %vm776_vm0, %v698_v9  ;;  %v538_v12 = vadd.f32 %v2141_v35, %v537_v10 }
 0x197   : > { %v539_v13 = vpop.f32.mrf.mxu0  ;;  %v702_v14 = vpop.f32.mrf.mxu1 }
 0x198   : > { %794 = vst.msk [vmem:[%s2144_s15 + $0x88] sm:$0xff] %vm776_vm0, %v538_v12  ;;  %v703_v15 = vadd.f32 %v2141_v35, %v702_v14 }
 0x199   : > { %v542_v16 = vpop.f32.mrf.mxu0  ;;  %v704_v17 = vpop.f32.mrf.mxu1 }
 0x19a   : > { %827 = vst.msk [vmem:[%s2144_s15 + $0x190] sm:$0xff] %vm776_vm0, %v703_v15  ;;  %v543_v18 = vadd.f32 %v2141_v35, %v542_v16 }
 0x19b   : > { %v544_v19 = vpop.f32.mrf.mxu0  ;;  %v707_v20 = vpop.f32.mrf.mxu1 }
 0x19c   : > { %795 = vst.msk [vmem:[%s2144_s15 + $0x90] sm:$0xff] %vm776_vm0, %v543_v18  ;;  %v708_v21 = vadd.f32 %v2141_v35, %v707_v20 }
 0x19d   : > { %v547_v22 = vpop.f32.mrf.mxu0  ;;  %v709_v23 = vpop.f32.mrf.mxu1 }
 0x19e   : > { %828 = vst.msk [vmem:[%s2144_s15 + $0x198] sm:$0xff] %vm776_vm0, %v708_v21  ;;  %v548_v24 = vadd.f32 %v2141_v35, %v547_v22 }
 0x19f   : > { %v549_v25 = vpop.f32.mrf.mxu0  ;;  %v712_v26 = vpop.f32.mrf.mxu1 }
 0x1a0   : > { %796 = vst.msk [vmem:[%s2144_s15 + $0x98] sm:$0xff] %vm776_vm0, %v548_v24  ;;  %v713_v27 = vadd.f32 %v2141_v35, %v712_v26 }
 0x1a1   : > { %v552_v28 = vpop.f32.mrf.mxu0  ;;  %v714_v29 = vpop.f32.mrf.mxu1 }
 0x1a2   : > { %829 = vst.msk [vmem:[%s2144_s15 + $0x1a0] sm:$0xff] %vm776_vm0, %v713_v27  ;;  %v553_v30 = vadd.f32 %v2141_v35, %v552_v28 }
 0x1a3   : > { %v554_v31 = vpop.f32.mrf.mxu0  ;;  %v717_v32 = vpop.f32.mrf.mxu1 }
 0x1a4   : > { %797 = vst.msk [vmem:[%s2144_s15 + $0xa0] sm:$0xff] %vm776_vm0, %v553_v30  ;;  %v718_v33 = vadd.f32 %v2141_v35, %v717_v32 }
 0x1a5   : > { %v557_v34 = vpop.f32.mrf.mxu0  ;;  %v719_v36 = vpop.f32.mrf.mxu1 }
 0x1a6   : > { %830 = vst.msk [vmem:[%s2144_s15 + $0x1a8] sm:$0xff] %vm776_vm0, %v718_v33  ;;  %v558_v37 = vadd.f32 %v2141_v35, %v557_v34 }
 0x1a7   : > { %v559_v38 = vpop.f32.mrf.mxu0  ;;  %v722_v39 = vpop.f32.mrf.mxu1 }
 0x1a8   : > { %798 = vst.msk [vmem:[%s2144_s15 + $0xa8] sm:$0xff] %vm776_vm0, %v558_v37  ;;  %v723_v40 = vadd.f32 %v2141_v35, %v722_v39 }
 0x1a9   : > { %v562_v41 = vpop.f32.mrf.mxu0  ;;  %v724_v42 = vpop.f32.mrf.mxu1 }
 0x1aa   : > { %831 = vst.msk [vmem:[%s2144_s15 + $0x1b0] sm:$0xff] %vm776_vm0, %v723_v40  ;;  %v563_v43 = vadd.f32 %v2141_v35, %v562_v41 }
 0x1ab   : > { %v564_v44 = vpop.f32.mrf.mxu0  ;;  %v727_v45 = vpop.f32.mrf.mxu1 }
 0x1ac   : > { %799 = vst.msk [vmem:[%s2144_s15 + $0xb0] sm:$0xff] %vm776_vm0, %v563_v43  ;;  %v728_v46 = vadd.f32 %v2141_v35, %v727_v45 }
 0x1ad   : > { %v567_v47 = vpop.f32.mrf.mxu0  ;;  %v729_v48 = vpop.f32.mrf.mxu1 }
 0x1ae   : > { %832 = vst.msk [vmem:[%s2144_s15 + $0x1b8] sm:$0xff] %vm776_vm0, %v728_v46  ;;  %v568_v49 = vadd.f32 %v2141_v35, %v567_v47 }
 0x1af   : > { %v569_v50 = vpop.f32.mrf.mxu0  ;;  %v732_v51 = vpop.f32.mrf.mxu1 }
 0x1b0   : > { %800 = vst.msk [vmem:[%s2144_s15 + $0xb8] sm:$0xff] %vm776_vm0, %v568_v49  ;;  %v733_v52 = vadd.f32 %v2141_v35, %v732_v51 }
 0x1b1   : > { %v572_v53 = vpop.f32.mrf.mxu0  ;;  %v734_v54 = vpop.f32.mrf.mxu1 }
 0x1b2   : > { %833 = vst.msk [vmem:[%s2144_s15 + $0x1c0] sm:$0xff] %vm776_vm0, %v733_v52  ;;  %v573_v55 = vadd.f32 %v2141_v35, %v572_v53 }
 0x1b3   : > { %v574_v56 = vpop.f32.mrf.mxu0  ;;  %v737_v57 = vpop.f32.mrf.mxu1 }
 0x1b4   : > { %801 = vst.msk [vmem:[%s2144_s15 + $0xc0] sm:$0xff] %vm776_vm0, %v573_v55  ;;  %v738_v58 = vadd.f32 %v2141_v35, %v737_v57 }
 0x1b5   : > { %v577_v59 = vpop.f32.mrf.mxu0  ;;  %v739_v60 = vpop.f32.mrf.mxu1 }
 0x1b6   : > { %834 = vst.msk [vmem:[%s2144_s15 + $0x1c8] sm:$0xff] %vm776_vm0, %v738_v58  ;;  %v578_v61 = vadd.f32 %v2141_v35, %v577_v59 }
 0x1b7   : > { %v579_v62 = vpop.f32.mrf.mxu0  ;;  %v742_v63 = vpop.f32.mrf.mxu1 }
 0x1b8   : > { %802 = vst.msk [vmem:[%s2144_s15 + $0xc8] sm:$0xff] %vm776_vm0, %v578_v61  ;;  %v743_v0 = vadd.f32 %v2141_v35, %v742_v63 }
 0x1b9   : > { %v582_v1 = vpop.f32.mrf.mxu0  ;;  %v744_v2 = vpop.f32.mrf.mxu1 }
 0x1ba   : > { %835 = vst.msk [vmem:[%s2144_s15 + $0x1d0] sm:$0xff] %vm776_vm0, %v743_v0  ;;  %v583_v3 = vadd.f32 %v2141_v35, %v582_v1 }
 0x1bb   : > { %v584_v4 = vpop.f32.mrf.mxu0  ;;  %v747_v5 = vpop.f32.mrf.mxu1 }
 0x1bc   : > { %803 = vst.msk [vmem:[%s2144_s15 + $0xd0] sm:$0xff] %vm776_vm0, %v583_v3  ;;  %v748_v6 = vadd.f32 %v2141_v35, %v747_v5 }
 0x1bd   : > { %v587_v7 = vpop.f32.mrf.mxu0  ;;  %v749_v8 = vpop.f32.mrf.mxu1 }
 0x1be   : > { %836 = vst.msk [vmem:[%s2144_s15 + $0x1d8] sm:$0xff] %vm776_vm0, %v748_v6  ;;  %v588_v9 = vadd.f32 %v2141_v35, %v587_v7 }
 0x1bf   : > { %v589_v10 = vpop.f32.mrf.mxu0  ;;  %v752_v11 = vpop.f32.mrf.mxu1 }
 0x1c0   : > { %804 = vst.msk [vmem:[%s2144_s15 + $0xd8] sm:$0xff] %vm776_vm0, %v588_v9  ;;  %v753_v12 = vadd.f32 %v2141_v35, %v752_v11 }
 0x1c1   : > { %v592_v13 = vpop.f32.mrf.mxu0  ;;  %v754_v14 = vpop.f32.mrf.mxu1 }
 0x1c2   : > { %837 = vst.msk [vmem:[%s2144_s15 + $0x1e0] sm:$0xff] %vm776_vm0, %v753_v12  ;;  %v593_v15 = vadd.f32 %v2141_v35, %v592_v13 }
 0x1c3   : > { %v594_v16 = vpop.f32.mrf.mxu0  ;;  %v757_v17 = vpop.f32.mrf.mxu1 }
 0x1c4   : > { %805 = vst.msk [vmem:[%s2144_s15 + $0xe0] sm:$0xff] %vm776_vm0, %v593_v15  ;;  %v758_v18 = vadd.f32 %v2141_v35, %v757_v17 }
 0x1c5   : > { %v597_v19 = vpop.f32.mrf.mxu0  ;;  %v759_v20 = vpop.f32.mrf.mxu1 }
 0x1c6   : > { %838 = vst.msk [vmem:[%s2144_s15 + $0x1e8] sm:$0xff] %vm776_vm0, %v758_v18  ;;  %v598_v21 = vadd.f32 %v2141_v35, %v597_v19 }
 0x1c7   : > { %v599_v22 = vpop.f32.mrf.mxu0  ;;  %v762_v23 = vpop.f32.mrf.mxu1 }
 0x1c8   : > { %806 = vst.msk [vmem:[%s2144_s15 + $0xe8] sm:$0xff] %vm776_vm0, %v598_v21  ;;  %v763_v24 = vadd.f32 %v2141_v35, %v762_v23 }
 0x1c9   : > { %v602_v25 = vpop.f32.mrf.mxu0  ;;  %v764_v26 = vpop.f32.mrf.mxu1 }
 0x1ca   : > { %839 = vst.msk [vmem:[%s2144_s15 + $0x1f0] sm:$0xff] %vm776_vm0, %v763_v24  ;;  %v603_v27 = vadd.f32 %v2141_v35, %v602_v25 }
 0x1cb   : > { %v604_v28 = vpop.f32.mrf.mxu0  ;;  %v767_v29 = vpop.f32.mrf.mxu1 }
 0x1cc   : > { %807 = vst.msk [vmem:[%s2144_s15 + $0xf0] sm:$0xff] %vm776_vm0, %v603_v27  ;;  %v768_v30 = vadd.f32 %v2141_v35, %v767_v29 }
 0x1cd   : > { %v607_v31 = vpop.f32.mrf.mxu0  ;;  %v769_v32 = vpop.f32.mrf.mxu1 }
 0x1ce   : > { %840 = vst.msk [vmem:[%s2144_s15 + $0x1f8] sm:$0xff] %vm776_vm0, %v768_v30  ;;  %v608_v33 = vadd.f32 %v2141_v35, %v607_v31 }
 0x1cf   : > { %v609_v34 = vpop.f32.mrf.mxu0  ;;  %v772_v36 = vpop.f32.mrf.mxu1 }
 0x1d0   : > { %808 = vst.msk [vmem:[%s2144_s15 + $0xf8] sm:$0xff] %vm776_vm0, %v608_v33  ;;  %v773_v37 = vadd.f32 %v2141_v35, %v772_v36  ;;  %848 = sbr.rel (!%p2559_p5) target bundleno = 533 (0x215), region = 44 }
 0x1d1   : > { %v612_v38 = vpop.f32.mrf.mxu0  ;;  %v774_v39 = vpop.f32.mrf.mxu1 }
 0x1d2   : > { %841 = vst.msk [vmem:[%s2144_s15 + $0x200] sm:$0xff] %vm776_vm0, %v773_v37  ;;  %v613_v40 = vadd.f32 %v2141_v35, %v612_v38 }
 0x1d3   : > { %v614_v41 = vpop.f32.mrf.mxu0 }
 0x1d4   : > { %809 = vst.msk [vmem:[%s2144_s15 + $0x100] sm:$0xff] %vm776_vm0, %v613_v40 }
 0x1d5   : > { %s2572_s29 = smov (!%p851_p11, %s850_s29), 65 }
 0x1d6   : > { %s1345_s6 = sshll.u32 %s2572_s29, 7 }
 0x1d7   : > { %p1348_p4 = scmp.eq.s32.totalorder %s1345_s6, 0 }
 0x1d8   : > { %s2353_s23 = sshrl.u32 (!%p1348_p4), %s2572_s29, 6 }
 0x1d9   : > { %859 = sbr.rel (%p1348_p4) target bundleno = 533 (0x215), region = 48  ;;  %p1349_p2 = scmp.le.s32.totalorder (!%p1348_p4), %s2353_s23, 0 }
 0x1de   : > { %1275 = sbr.rel (%p1349_p2) target bundleno = 516 (0x204), region = 130  ;;  %s2560_s16 = smov (!%p1349_p2), %s2347_s5 }
 0x1df   : > { %s2561_s7 = smov (!%p1349_p2), %s2144_s15  ;;  %s2362_s9 = smov (!%p1349_p2), 0  }
 0x1e0   : > { %s2364_s11 = smov (!%p1349_p2), 0  }
 0x1e3 LB: >> { %v1048_v35 = vld [vmem:[%s1675_s7] sm:$0xff]  ;;  %v1050_v42 = vld [vmem:[%s1675_s7 + $0x8] sm:$0xff]  ;;  %v1052_v43 = vld [vmem:[%s1675_s7 + $0x10] sm:$0xff]  ;;  %s1176_s19 = sadd.s32 1, %s1679_s9  ;;  %s1042_s11 = sadd.s32 1, %s1683_s11   ;;  %s1683_s11 = sphi %s2364_s11, %s1042_s11   ;;  %s1679_s9 = sphi %s2362_s9, %s2564_s9   ;;  %s1675_s7 = sphi %s2561_s7, %s2563_s7   ;;  %s1671_s16 = sphi %s2560_s16, %s2562_s16  }
 0x1e4   : >> { %1049 = vst [vmem:[%s1671_s16] sm:$0xff] %v1048_v35  ;;  %1051 = vst [vmem:[%s1671_s16 + $0x8] sm:$0xff] %v1050_v42  ;;  %v1054_v44 = vld [vmem:[%s1675_s7 + $0x18] sm:$0xff]  ;;  %v1056_v45 = vld [vmem:[%s1675_s7 + $0x20] sm:$0xff]  ;;  %p1177_p3 = scmp.ge.s32.totalorder %s1176_s19, %s2353_s23  ;;  %p1041_p1 = scmp.ge.s32.totalorder %s1042_s11, %s2353_s23 }
 0x1e5   : >> { %1053 = vst [vmem:[%s1671_s16 + $0x10] sm:$0xff] %v1052_v43  ;;  %v1058_v46 = vld [vmem:[%s1675_s7 + $0x28] sm:$0xff]  ;;  %1055 = vst [vmem:[%s1671_s16 + $0x18] sm:$0xff] %v1054_v44  ;;  %v1060_v47 = vld [vmem:[%s1675_s7 + $0x30] sm:$0xff] }
 0x1e6   : >> { %1057 = vst [vmem:[%s1671_s16 + $0x20] sm:$0xff] %v1056_v45  ;;  %1059 = vst [vmem:[%s1671_s16 + $0x28] sm:$0xff] %v1058_v46  ;;  %v1062_v48 = vld [vmem:[%s1675_s7 + $0x38] sm:$0xff]  ;;  %v1064_v49 = vld [vmem:[%s1675_s7 + $0x40] sm:$0xff]  ;;  %s2574_s19 = smov (%p1177_p3, %s1176_s19), 0 }
 0x1e7   : >> { %1061 = vst [vmem:[%s1671_s16 + $0x30] sm:$0xff] %v1060_v47  ;;  %1063 = vst [vmem:[%s1671_s16 + $0x38] sm:$0xff] %v1062_v48  ;;  %v1066_v50 = vld [vmem:[%s1675_s7 + $0x48] sm:$0xff]  ;;  %v1068_v51 = vld [vmem:[%s1675_s7 + $0x50] sm:$0xff]  ;;  %s1350_s21 = sshll.u32 %s2574_s19, 9  ;;  %s2564_s9 = smov %s2574_s19 }
 0x1e8   : >> { %1065 = vst [vmem:[%s1671_s16 + $0x40] sm:$0xff] %v1064_v49  ;;  %v1070_v52 = vld [vmem:[%s1675_s7 + $0x58] sm:$0xff]  ;;  %1067 = vst [vmem:[%s1671_s16 + $0x48] sm:$0xff] %v1066_v50  ;;  %v1072_v53 = vld [vmem:[%s1675_s7 + $0x60] sm:$0xff]  ;;  %s2420_s24 = scalar_lea.vmem %s2144_s15, %s1350_s21 [#allocation6]   ;;  %s2423_s8 = scalar_lea.vmem %s2347_s5, %s1350_s21  }
 0x1e9   : >> { %1069 = vst [vmem:[%s1671_s16 + $0x50] sm:$0xff] %v1068_v51  ;;  %1071 = vst [vmem:[%s1671_s16 + $0x58] sm:$0xff] %v1070_v52  ;;  %v1074_v54 = vld [vmem:[%s1675_s7 + $0x68] sm:$0xff]  ;;  %v1076_v55 = vld [vmem:[%s1675_s7 + $0x70] sm:$0xff] }
 0x1ea   : >> { %1073 = vst [vmem:[%s1671_s16 + $0x60] sm:$0xff] %v1072_v53  ;;  %1075 = vst [vmem:[%s1671_s16 + $0x68] sm:$0xff] %v1074_v54  ;;  %v1078_v56 = vld [vmem:[%s1675_s7 + $0x78] sm:$0xff]  ;;  %v1080_v57 = vld [vmem:[%s1675_s7 + $0x80] sm:$0xff] }
 0x1eb   : >> { %1077 = vst [vmem:[%s1671_s16 + $0x70] sm:$0xff] %v1076_v55  ;;  %v1082_v58 = vld [vmem:[%s1675_s7 + $0x88] sm:$0xff]  ;;  %1079 = vst [vmem:[%s1671_s16 + $0x78] sm:$0xff] %v1078_v56  ;;  %v1084_v59 = vld [vmem:[%s1675_s7 + $0x90] sm:$0xff] }
 0x1ec   : >> { %1081 = vst [vmem:[%s1671_s16 + $0x80] sm:$0xff] %v1080_v57  ;;  %1083 = vst [vmem:[%s1671_s16 + $0x88] sm:$0xff] %v1082_v58  ;;  %v1086_v60 = vld [vmem:[%s1675_s7 + $0x98] sm:$0xff]  ;;  %v1088_v61 = vld [vmem:[%s1675_s7 + $0xa0] sm:$0xff] }
 0x1ed   : >> { %1085 = vst [vmem:[%s1671_s16 + $0x90] sm:$0xff] %v1084_v59  ;;  %1087 = vst [vmem:[%s1671_s16 + $0x98] sm:$0xff] %v1086_v60  ;;  %v1090_v62 = vld [vmem:[%s1675_s7 + $0xa8] sm:$0xff]  ;;  %v1092_v63 = vld [vmem:[%s1675_s7 + $0xb0] sm:$0xff] }
 0x1ee   : >> { %1089 = vst [vmem:[%s1671_s16 + $0xa0] sm:$0xff] %v1088_v61  ;;  %v1094_v0 = vld [vmem:[%s1675_s7 + $0xb8] sm:$0xff]  ;;  %1091 = vst [vmem:[%s1671_s16 + $0xa8] sm:$0xff] %v1090_v62  ;;  %v1096_v1 = vld [vmem:[%s1675_s7 + $0xc0] sm:$0xff] }
 0x1ef   : >> { %1093 = vst [vmem:[%s1671_s16 + $0xb0] sm:$0xff] %v1092_v63  ;;  %1095 = vst [vmem:[%s1671_s16 + $0xb8] sm:$0xff] %v1094_v0  ;;  %v1098_v2 = vld [vmem:[%s1675_s7 + $0xc8] sm:$0xff]  ;;  %v1100_v3 = vld [vmem:[%s1675_s7 + $0xd0] sm:$0xff] }
 0x1f0   : >> { %1097 = vst [vmem:[%s1671_s16 + $0xc0] sm:$0xff] %v1096_v1  ;;  %1099 = vst [vmem:[%s1671_s16 + $0xc8] sm:$0xff] %v1098_v2  ;;  %v1102_v4 = vld [vmem:[%s1675_s7 + $0xd8] sm:$0xff]  ;;  %v1104_v5 = vld [vmem:[%s1675_s7 + $0xe0] sm:$0xff] }
 0x1f1   : >> { %1101 = vst [vmem:[%s1671_s16 + $0xd0] sm:$0xff] %v1100_v3  ;;  %v1106_v6 = vld [vmem:[%s1675_s7 + $0xe8] sm:$0xff]  ;;  %1103 = vst [vmem:[%s1671_s16 + $0xd8] sm:$0xff] %v1102_v4  ;;  %v1108_v7 = vld [vmem:[%s1675_s7 + $0xf0] sm:$0xff] }
 0x1f2   : >> { %1105 = vst [vmem:[%s1671_s16 + $0xe0] sm:$0xff] %v1104_v5  ;;  %1107 = vst [vmem:[%s1671_s16 + $0xe8] sm:$0xff] %v1106_v6  ;;  %v1110_v8 = vld [vmem:[%s1675_s7 + $0xf8] sm:$0xff]  ;;  %v1112_v9 = vld [vmem:[%s1675_s7 + $0x100] sm:$0xff] }
 0x1f3   : >> { %1109 = vst [vmem:[%s1671_s16 + $0xf0] sm:$0xff] %v1108_v7  ;;  %1111 = vst [vmem:[%s1671_s16 + $0xf8] sm:$0xff] %v1110_v8  ;;  %v1114_v10 = vld [vmem:[%s1675_s7 + $0x108] sm:$0xff]  ;;  %v1116_v11 = vld [vmem:[%s1675_s7 + $0x110] sm:$0xff] }
 0x1f4   : >> { %1113 = vst [vmem:[%s1671_s16 + $0x100] sm:$0xff] %v1112_v9  ;;  %v1118_v12 = vld [vmem:[%s1675_s7 + $0x118] sm:$0xff]  ;;  %1115 = vst [vmem:[%s1671_s16 + $0x108] sm:$0xff] %v1114_v10  ;;  %v1120_v13 = vld [vmem:[%s1675_s7 + $0x120] sm:$0xff] }
 0x1f5   : >> { %1117 = vst [vmem:[%s1671_s16 + $0x110] sm:$0xff] %v1116_v11  ;;  %1119 = vst [vmem:[%s1671_s16 + $0x118] sm:$0xff] %v1118_v12  ;;  %v1122_v14 = vld [vmem:[%s1675_s7 + $0x128] sm:$0xff]  ;;  %v1124_v15 = vld [vmem:[%s1675_s7 + $0x130] sm:$0xff] }
 0x1f6   : >> { %1121 = vst [vmem:[%s1671_s16 + $0x120] sm:$0xff] %v1120_v13  ;;  %1123 = vst [vmem:[%s1671_s16 + $0x128] sm:$0xff] %v1122_v14  ;;  %v1126_v16 = vld [vmem:[%s1675_s7 + $0x138] sm:$0xff]  ;;  %v1128_v17 = vld [vmem:[%s1675_s7 + $0x140] sm:$0xff] }
 0x1f7   : >> { %1125 = vst [vmem:[%s1671_s16 + $0x130] sm:$0xff] %v1124_v15  ;;  %v1130_v18 = vld [vmem:[%s1675_s7 + $0x148] sm:$0xff]  ;;  %1127 = vst [vmem:[%s1671_s16 + $0x138] sm:$0xff] %v1126_v16  ;;  %v1132_v19 = vld [vmem:[%s1675_s7 + $0x150] sm:$0xff] }
 0x1f8   : >> { %1129 = vst [vmem:[%s1671_s16 + $0x140] sm:$0xff] %v1128_v17  ;;  %1131 = vst [vmem:[%s1671_s16 + $0x148] sm:$0xff] %v1130_v18  ;;  %v1134_v20 = vld [vmem:[%s1675_s7 + $0x158] sm:$0xff]  ;;  %v1136_v21 = vld [vmem:[%s1675_s7 + $0x160] sm:$0xff] }
 0x1f9   : >> { %1133 = vst [vmem:[%s1671_s16 + $0x150] sm:$0xff] %v1132_v19  ;;  %1135 = vst [vmem:[%s1671_s16 + $0x158] sm:$0xff] %v1134_v20  ;;  %v1138_v22 = vld [vmem:[%s1675_s7 + $0x168] sm:$0xff]  ;;  %v1140_v23 = vld [vmem:[%s1675_s7 + $0x170] sm:$0xff] }
 0x1fa   : >> { %1137 = vst [vmem:[%s1671_s16 + $0x160] sm:$0xff] %v1136_v21  ;;  %v1142_v24 = vld [vmem:[%s1675_s7 + $0x178] sm:$0xff]  ;;  %1139 = vst [vmem:[%s1671_s16 + $0x168] sm:$0xff] %v1138_v22  ;;  %v1144_v25 = vld [vmem:[%s1675_s7 + $0x180] sm:$0xff] }
 0x1fb   : >> { %1141 = vst [vmem:[%s1671_s16 + $0x170] sm:$0xff] %v1140_v23  ;;  %1143 = vst [vmem:[%s1671_s16 + $0x178] sm:$0xff] %v1142_v24  ;;  %v1146_v26 = vld [vmem:[%s1675_s7 + $0x188] sm:$0xff]  ;;  %v1148_v27 = vld [vmem:[%s1675_s7 + $0x190] sm:$0xff] }
 0x1fc   : >> { %1145 = vst [vmem:[%s1671_s16 + $0x180] sm:$0xff] %v1144_v25  ;;  %1147 = vst [vmem:[%s1671_s16 + $0x188] sm:$0xff] %v1146_v26  ;;  %v1150_v28 = vld [vmem:[%s1675_s7 + $0x198] sm:$0xff]  ;;  %v1152_v29 = vld [vmem:[%s1675_s7 + $0x1a0] sm:$0xff] }
 0x1fd   : >> { %1149 = vst [vmem:[%s1671_s16 + $0x190] sm:$0xff] %v1148_v27  ;;  %v1154_v30 = vld [vmem:[%s1675_s7 + $0x1a8] sm:$0xff]  ;;  %1151 = vst [vmem:[%s1671_s16 + $0x198] sm:$0xff] %v1150_v28  ;;  %v1156_v31 = vld [vmem:[%s1675_s7 + $0x1b0] sm:$0xff] }
 0x1fe   : >> { %1153 = vst [vmem:[%s1671_s16 + $0x1a0] sm:$0xff] %v1152_v29  ;;  %1155 = vst [vmem:[%s1671_s16 + $0x1a8] sm:$0xff] %v1154_v30  ;;  %v1158_v32 = vld [vmem:[%s1675_s7 + $0x1b8] sm:$0xff]  ;;  %v1160_v33 = vld [vmem:[%s1675_s7 + $0x1c0] sm:$0xff] }
 0x1ff   : >> { %1157 = vst [vmem:[%s1671_s16 + $0x1b0] sm:$0xff] %v1156_v31  ;;  %1159 = vst [vmem:[%s1671_s16 + $0x1b8] sm:$0xff] %v1158_v32  ;;  %v1162_v34 = vld [vmem:[%s1675_s7 + $0x1c8] sm:$0xff]  ;;  %v1164_v36 = vld [vmem:[%s1675_s7 + $0x1d0] sm:$0xff]  ;;  %1044 = sbr.rel (!%p1041_p1) target bundleno = 483 (0x1e3), region = 136 }
 0x200   : >> { %1161 = vst [vmem:[%s1671_s16 + $0x1c0] sm:$0xff] %v1160_v33  ;;  %v1166_v37 = vld [vmem:[%s1675_s7 + $0x1d8] sm:$0xff]  ;;  %1163 = vst [vmem:[%s1671_s16 + $0x1c8] sm:$0xff] %v1162_v34  ;;  %v1168_v38 = vld [vmem:[%s1675_s7 + $0x1e0] sm:$0xff] }
 0x201   : >> { %1165 = vst [vmem:[%s1671_s16 + $0x1d0] sm:$0xff] %v1164_v36  ;;  %1167 = vst [vmem:[%s1671_s16 + $0x1d8] sm:$0xff] %v1166_v37  ;;  %v1170_v39 = vld [vmem:[%s1675_s7 + $0x1e8] sm:$0xff]  ;;  %v1172_v40 = vld [vmem:[%s1675_s7 + $0x1f0] sm:$0xff] }
 0x202   : >> { %1169 = vst [vmem:[%s1671_s16 + $0x1e0] sm:$0xff] %v1168_v38  ;;  %1171 = vst [vmem:[%s1671_s16 + $0x1e8] sm:$0xff] %v1170_v39  ;;  %v1174_v41 = vld [vmem:[%s1675_s7 + $0x1f8] sm:$0xff]  ;;  %s2563_s7 = smov %s2420_s24 }
 0x203   : >> { %1173 = vst [vmem:[%s1671_s16 + $0x1f0] sm:$0xff] %v1172_v40  ;;  %1175 = vst [vmem:[%s1671_s16 + $0x1f8] sm:$0xff] %v1174_v41  ;;  %s2562_s16 = smov %s2423_s8 }
 0x204 PF: > { %s2528_s10 = sand.u32 63, %s2572_s29   ;;  %s1364_s18 = sshll.u32 %s2353_s23, 9 }
 0x205   : > { %s1187_s22 = scalar_lea.vmem %s2144_s15, %s1364_s18 [#allocation6]   ;;  %s1189_s25 = scalar_lea.vmem %s2347_s5, %s1364_s18  }
 0x206   : > { %p1355_p6 = scmp.le.s32.totalorder %s2528_s10, 0 }
 0x207   : > { %s1685_s27 = smov (!%p1355_p6), %s1189_s25   ;;  %s1689_s28 = smov (!%p1355_p6), %s1187_s22  }
 0x208   : > { %1289 = sbr.rel (%p1355_p6) target bundleno = 533 (0x215), region = 141  ;;  %s1693_s12 = smov (!%p1355_p6), 0  }
 0x209   : > { %s1697_s26 = smov (!%p1355_p6), 0  }
 0x20d LB: >> { %v1199_v35 = vld [vmem:[%s1691_s28] sm:$0xff]  ;;  %s1201_s29 = sadd.s32 1, %s1695_s12  ;;  %s1193_s26 = sadd.s32 1, %s1699_s26   ;;  %s1699_s26 = sphi %s1697_s26, %s1193_s26   ;;  %s1695_s12 = sphi %s1693_s12, %s1694_s12   ;;  %s1691_s28 = sphi %s1689_s28, %s1206_s28   ;;  %s1687_s27 = sphi %s1685_s27, %s1207_s27  }
 0x20e   : >> { %1200 = vst [vmem:[%s1687_s27] sm:$0xff] %v1199_v35  ;;  %p1202_p7 = scmp.ge.s32.totalorder %s1201_s29, %s2528_s10  ;;  %p1192_p9 = scmp.ge.s32.totalorder %s1193_s26, %s2528_s10 }
 0x210   : >> { %s2576_s29 = smov (%p1202_p7, %s1201_s29), 0  ;;  %1195 = sbr.rel (!%p1192_p9) target bundleno = 525 (0x20d), region = 147 }
 0x211   : >> { %s1356_s15 = sshll.u32 %s2576_s29, 3  ;;  %s1694_s12 = smov %s2576_s29  }
 0x212   : >> { %s1206_s28 = scalar_lea.vmem %s1187_s22, %s1356_s15 [#allocation6]   ;;  %s1207_s27 = scalar_lea.vmem %s1189_s25, %s1356_s15  }
 0x215 PF: > { %p14_p12 = scmp.ge.s32.totalorder %s1748_s17, 4   ;;  %s2565_s12 = smov %s1659_s13 }
 0x216   : > { %s2566_s13 = smov %s1663_s14  ;;  %s2567_s14 = smov %s1758_s20 }
 0x217   : > { %s2568_s15 = smov %s1748_s17  ;;  %16 = sbr.rel (!%p14_p12) target bundleno = 4 (0x4), region = 158 }
 0x21c   :  { %1223 = vsyncpa [#allocation3], 1 }
 0x21d   :  { %1225 = vsyncpa [#allocation3 + $0x1], 1 }
 0x21e   :  { %1226 = vsyncpa [#allocation5], 1 }

</bundles_post_ra>
